<compile_context>
chip_gen: v7x
topology: tpu7x:2x2x1
jax: 0.10.0
libtpu: 0.0.40
codegen_flags: <defaults>
</compile_context>

<pallas_src>
import numpy as np

import jax
import jax.numpy as jnp
from jax.experimental import pallas as pl
from jax.experimental.pallas import tpu as pltpu


# ----------------------------------------------------------------------------
# Fused forward kernel: one grid step == one image; everything stays in VMEM.
# ----------------------------------------------------------------------------
def _fused_forward_kernel(x_ref, t1e_ref, t1o_ref, b1_ref, t2e_ref, t2o_ref,
                          b2_ref, g1_ref, bf1_ref, wf2_ref, bf2_ref,
                          o_ref, p1_ref, p2_ref):
    f32 = jnp.float32

    # ---- conv1 (3->6, k=4, valid) + ReLU + 2x2 max-pool ---------------------
    # Width pooling is pre-folded into the two weight slabs t1e / t1o (even /
    # odd pooled output columns); height pooling is done with 0/1 selection
    # matmuls below.  Lane layout of y1*/z1: [pooled_col * 6 + out_channel].
    y1e = jnp.zeros((29, 84), f32)
    y1o = jnp.zeros((29, 84), f32)
    for kh in range(4):
        for ci in range(3):
            xs = x_ref[0, ci, pl.ds(kh, 29), :]                       # (29, 32)
            y1e = y1e + jnp.dot(xs, t1e_ref[kh, ci],
                                preferred_element_type=f32)
            y1o = y1o + jnp.dot(xs, t1o_ref[kh, ci],
                                preferred_element_type=f32)
    z1 = jnp.maximum(jnp.maximum(y1e, y1o) + b1_ref[...], 0.0)        # (29, 84)

    row = jax.lax.broadcasted_iota(jnp.int32, (14, 29), 0)
    col = jax.lax.broadcasted_iota(jnp.int32, (14, 29), 1)
    sel_e = (col == 2 * row).astype(f32)          # picks conv rows 0,2,...,26
    sel_o = (col == 2 * row + 1).astype(f32)      # picks conv rows 1,3,...,27
    p1_ref[...] = jnp.maximum(
        jnp.dot(sel_e, z1, preferred_element_type=f32),
        jnp.dot(sel_o, z1, preferred_element_type=f32))               # (14, 84)

    # ---- conv2 (6->9, k=5, valid) + ReLU + 2x2 max-pool ---------------------
    y2e = jnp.zeros((10, 45), f32)
    y2o = jnp.zeros((10, 45), f32)
    for kh in range(5):
        ps = p1_ref[pl.ds(kh, 10), :]                                 # (10, 84)
        y2e = y2e + jnp.dot(ps, t2e_ref[kh], preferred_element_type=f32)
        y2o = y2o + jnp.dot(ps, t2o_ref[kh], preferred_element_type=f32)
    z2 = jnp.maximum(jnp.maximum(y2e, y2o) + b2_ref[...], 0.0)        # (10, 45)

    row2 = jax.lax.broadcasted_iota(jnp.int32, (5, 10), 0)
    col2 = jax.lax.broadcasted_iota(jnp.int32, (5, 10), 1)
    sel2_e = (col2 == 2 * row2).astype(f32)
    sel2_o = (col2 == 2 * row2 + 1).astype(f32)
    p2_ref[...] = jnp.maximum(
        jnp.dot(sel2_e, z2, preferred_element_type=f32),
        jnp.dot(sel2_o, z2, preferred_element_type=f32))              # (5, 45)

    # ---- fc1 (225->80) + ReLU ------------------------------------------------
    # The torch NCHW flatten permutation is folded into g1, so fc1 is a sum
    # over the 5 pooled rows of (1,45)@(45,80) matmuls, bias used as init.
    h1 = bf1_ref[...]                                                 # (1, 80)
    for h in range(5):
        h1 = h1 + jnp.dot(p2_ref[pl.ds(h, 1), :], g1_ref[h],
                          preferred_element_type=f32)
    h1 = jnp.maximum(h1, 0.0)

    # ---- fc2 (80->10): the only narrow HBM store of the whole model ---------
    o_ref[0] = jnp.dot(h1, wf2_ref[...], preferred_element_type=f32) + bf2_ref[...]


# ----------------------------------------------------------------------------
# Wrapper
# ----------------------------------------------------------------------------
def _pinned_spec(shape):
    nd = len(shape)
    return pl.BlockSpec(shape, lambda b: (0,) * nd)


@jax.jit
def conv_model_forward(x_nchw, packed):
    """x_nchw: (N, 3, 32, 32) float32 -> logits (N, 10) float32."""
    n = x_nchw.shape[0]
    in_specs = [
        pl.BlockSpec((1, 3, 32, 32), lambda b: (b, 0, 0, 0)),   # x (NCHW, native)
        _pinned_spec((4, 3, 32, 84)),                           # t1e
        _pinned_spec((4, 3, 32, 84)),                           # t1o
        _pinned_spec((1, 84)),                                  # b1 row
        _pinned_spec((5, 84, 45)),                              # t2e
        _pinned_spec((5, 84, 45)),                              # t2o
        _pinned_spec((1, 45)),                                  # b2 row
        _pinned_spec((5, 45, 80)),                              # g1 (fc1, permuted)
        _pinned_spec((1, 80)),                                  # fc1 bias
        _pinned_spec((80, 10)),                                 # fc2 weight (K, N)
        _pinned_spec((1, 10)),                                  # fc2 bias
    ]
    out = pl.pallas_call(
        _fused_forward_kernel,
        grid=(n,),
        in_specs=in_specs,
        out_specs=pl.BlockSpec((1, 1, 10), lambda b: (b, 0, 0)),
        out_shape=jax.ShapeDtypeStruct((n, 1, 10), jnp.float32),
        scratch_shapes=[pltpu.VMEM((14, 84), jnp.float32),      # pooled conv1
                        pltpu.VMEM((5, 45), jnp.float32)],      # pooled conv2
        compiler_params=pltpu.CompilerParams(
            dimension_semantics=("parallel",)),                 # shard batch over TCs
    )(x_nchw,
      packed["t1e"], packed["t1o"], packed["b1"],
      packed["t2e"], packed["t2o"], packed["b2"],
      packed["g1"], packed["bf1"], packed["wf2"], packed["bf2"])
    return out.reshape(n, 10)


# ----------------------------------------------------------------------------
# Parameters: PyTorch-layout init + one-time packing into kernel layouts.
# ----------------------------------------------------------------------------
def init_params(key):
    """Deterministic init mimicking PyTorch default uniform(-1/sqrt(fan_in), .)."""
    ks = jax.random.split(key, 8)

    def u(k, shape, fan_in):
        bound = 1.0 / jnp.sqrt(float(fan_in))
        return jax.random.uniform(k, shape, jnp.float32, -bound, bound)

    return {
        "conv1_w": u(ks[0], (6, 3, 4, 4), 3 * 4 * 4),
        "conv1_b": u(ks[1], (6,), 3 * 4 * 4),
        "conv2_w": u(ks[2], (9, 6, 5, 5), 6 * 5 * 5),
        "conv2_b": u(ks[3], (9,), 6 * 5 * 5),
        "fc1_w": u(ks[4], (80, 225), 225),
        "fc1_b": u(ks[5], (80,), 225),
        "fc2_w": u(ks[6], (10, 80), 80),
        "fc2_b": u(ks[7], (10,), 80),
    }


def pack_params(params):
    """One-time host-side packing of PyTorch-layout params into kernel slabs."""
    W1 = np.asarray(params["conv1_w"], np.float32)   # (6, 3, 4, 4)
    b1 = np.asarray(params["conv1_b"], np.float32)
    W2 = np.asarray(params["conv2_w"], np.float32)   # (9, 6, 5, 5)
    b2 = np.asarray(params["conv2_b"], np.float32)
    F1 = np.asarray(params["fc1_w"], np.float32)     # (80, 225)
    f1b = np.asarray(params["fc1_b"], np.float32)
    F2 = np.asarray(params["fc2_w"], np.float32)     # (10, 80)
    f2b = np.asarray(params["fc2_b"], np.float32)

    # conv1 Toeplitz slabs: T1e[kh, ci, w, j*6+co] = W1[co, ci, kh, w - 2j]
    # (even pooled cols), T1o uses w - (2j+1) (odd pooled cols).
    T1e = np.zeros((4, 3, 32, 14 * 6), np.float32)
    T1o = np.zeros_like(T1e)
    for kh in range(4):
        for kw in range(4):
            w_t = W1[:, :, kh, kw].T                     # (ci, co)
            for j in range(14):
                T1e[kh, :, 2 * j + kw,     j * 6:(j + 1) * 6] = w_t
                T1o[kh, :, 2 * j + 1 + kw, j * 6:(j + 1) * 6] = w_t
    b1row = np.tile(b1, 14)[None, :]                     # (1, 84)

    # conv2 Toeplitz slabs on the pooled-1 lane layout [j*6 + ci].
    T2e = np.zeros((5, 14 * 6, 5 * 9), np.float32)
    T2o = np.zeros_like(T2e)
    for kh in range(5):
        for kw in range(5):
            w_t = W2[:, :, kh, kw].T                     # (ci, co)
            for j2 in range(5):
                je = 2 * j2 + kw
                jo = 2 * j2 + 1 + kw
                T2e[kh, je * 6:(je + 1) * 6, j2 * 9:(j2 + 1) * 9] = w_t
                T2o[kh, jo * 6:(jo + 1) * 6, j2 * 9:(j2 + 1) * 9] = w_t
    b2row = np.tile(b2, 5)[None, :]                      # (1, 45)

    # fc1 with the torch NCHW flatten (k = c*25 + h*5 + w) folded in:
    # G1[h, w*9 + c, m] = fc1_w[m, c*25 + h*5 + w]
    G1 = np.zeros((5, 5 * 9, 80), np.float32)
    for h in range(5):
        for w in range(5):
            for c in range(9):
                G1[h, w * 9 + c, :] = F1[:, c * 25 + h * 5 + w]

    return {
        "t1e": jnp.asarray(T1e), "t1o": jnp.asarray(T1o), "b1": jnp.asarray(b1row),
        "t2e": jnp.asarray(T2e), "t2o": jnp.asarray(T2o), "b2": jnp.asarray(b2row),
        "g1": jnp.asarray(G1),
        "bf1": jnp.asarray(f1b[None, :]),
        "wf2": jnp.asarray(F2.T.copy()),                 # (80, 10)
        "bf2": jnp.asarray(f2b[None, :]),
    }


# ----------------------------------------------------------------------------
# Plain-JAX reference (for a correctness sanity check only).
# ----------------------------------------------------------------------------
def reference_forward(x_nchw, params):
    hp = jax.lax.Precision.HIGHEST
    y = jax.lax.conv_general_dilated(
        x_nchw, params["conv1_w"], window_strides=(1, 1), padding="VALID",
        dimension_numbers=("NCHW", "OIHW", "NCHW"), precision=hp)
    y = jnp.maximum(y + params["conv1_b"][None, :, None, None], 0.0)
    y = jax.lax.reduce_window(y, -jnp.inf, jax.lax.max,
                              (1, 1, 2, 2), (1, 1, 2, 2), "VALID")
    y = jax.lax.conv_general_dilated(
        y, params["conv2_w"], window_strides=(1, 1), padding="VALID",
        dimension_numbers=("NCHW", "OIHW", "NCHW"), precision=hp)
    y = jnp.maximum(y + params["conv2_b"][None, :, None, None], 0.0)
    y = jax.lax.reduce_window(y, -jnp.inf, jax.lax.max,
                              (1, 1, 2, 2), (1, 1, 2, 2), "VALID")
    y = y.reshape(y.shape[0], -1)                                  # NCHW flatten
    y = jnp.maximum(jnp.dot(y, params["fc1_w"].T, precision=hp)
                    + params["fc1_b"], 0.0)
    y = jnp.dot(y, params["fc2_w"].T, precision=hp) + params["fc2_b"]
    return y


if __name__ == "__main__":
    key = jax.random.PRNGKey(0)
    k_x, k_p = jax.random.split(key)
    x = jax.random.normal(k_x, (2, 3, 32, 32), dtype=jnp.float32)  # NCHW like PyTorch
    params = init_params(k_p)
    packed = pack_params(params)                                   # pack once

    out = conv_model_forward(x, packed)
    out = jax.block_until_ready(out)
    assert out.shape == (2, 10), out.shape
    assert out.dtype == jnp.float32

    ref = reference_forward(x, params)
    max_err = float(jnp.max(jnp.abs(out - ref)))
    assert max_err < 1e-2, f"max abs error vs reference: {max_err}"

    print("KERNEL_OK")
</pallas_src>

<mosaic_0001>
module attributes {stable_mosaic.version = 11 : i64} {
  func.func @_fused_forward_kernel(%arg0: i32, %arg1: memref<1x3x32x32xf32, #tpu.memory_space<vmem>>, %arg2: memref<4x3x32x84xf32, #tpu.memory_space<vmem>>, %arg3: memref<4x3x32x84xf32, #tpu.memory_space<vmem>>, %arg4: memref<1x84xf32, #tpu.memory_space<vmem>>, %arg5: memref<5x84x45xf32, #tpu.memory_space<vmem>>, %arg6: memref<5x84x45xf32, #tpu.memory_space<vmem>>, %arg7: memref<1x45xf32, #tpu.memory_space<vmem>>, %arg8: memref<5x45x80xf32, #tpu.memory_space<vmem>>, %arg9: memref<1x80xf32, #tpu.memory_space<vmem>>, %arg10: memref<80x10xf32, #tpu.memory_space<vmem>>, %arg11: memref<1x10xf32, #tpu.memory_space<vmem>>, %arg12: memref<1x1x10xf32, #tpu.memory_space<vmem>>, %arg13: memref<14x84xf32, #tpu.memory_space<vmem>>, %arg14: memref<5x45xf32, #tpu.memory_space<vmem>>) attributes {dimension_semantics = [#tpu.dimension_semantics<parallel>], iteration_bounds = array<i64: 2>, scalar_prefetch = 0 : i64, scratch_operands = 2 : i64, tpu.core_type = #tpu.core_type<tc>, window_params = [{transform_indices = @transform_0, window_bounds = array<i64: 1, 3, 32, 32>}, {pipeline_mode = #tpu.pipeline_mode<synchronous>, transform_indices = @transform_1, window_bounds = array<i64: 4, 3, 32, 84>}, {pipeline_mode = #tpu.pipeline_mode<synchronous>, transform_indices = @transform_2, window_bounds = array<i64: 4, 3, 32, 84>}, {pipeline_mode = #tpu.pipeline_mode<synchronous>, transform_indices = @transform_3, window_bounds = array<i64: 1, 84>}, {pipeline_mode = #tpu.pipeline_mode<synchronous>, transform_indices = @transform_4, window_bounds = array<i64: 5, 84, 45>}, {pipeline_mode = #tpu.pipeline_mode<synchronous>, transform_indices = @transform_5, window_bounds = array<i64: 5, 84, 45>}, {pipeline_mode = #tpu.pipeline_mode<synchronous>, transform_indices = @transform_6, window_bounds = array<i64: 1, 45>}, {pipeline_mode = #tpu.pipeline_mode<synchronous>, transform_indices = @transform_7, window_bounds = array<i64: 5, 45, 80>}, {pipeline_mode = #tpu.pipeline_mode<synchronous>, transform_indices = @transform_8, window_bounds = array<i64: 1, 80>}, {pipeline_mode = #tpu.pipeline_mode<synchronous>, transform_indices = @transform_9, window_bounds = array<i64: 80, 10>}, {pipeline_mode = #tpu.pipeline_mode<synchronous>, transform_indices = @transform_10, window_bounds = array<i64: 1, 10>}, {transform_indices = @transform_11, window_bounds = array<i64: 1, 1, 10>}]} {
    %cst = arith.constant 0.000000e+00 : f32
    %0 = vector.broadcast %cst : f32 to vector<29x84xf32>
    %cst_0 = arith.constant 0.000000e+00 : f32
    %1 = vector.broadcast %cst_0 : f32 to vector<29x84xf32>
    %c0 = arith.constant 0 : index
    %c0_1 = arith.constant 0 : index
    %c0_2 = arith.constant 0 : index
    %c0_3 = arith.constant 0 : index
    %2 = vector.load %arg1[%c0, %c0_1, %c0_2, %c0_3] : memref<1x3x32x32xf32, #tpu.memory_space<vmem>>, vector<1x1x29x32xf32>
    %3 = vector.shape_cast %2 : vector<1x1x29x32xf32> to vector<29x32xf32>
    %c0_4 = arith.constant 0 : index
    %c0_5 = arith.constant 0 : index
    %c0_6 = arith.constant 0 : index
    %c0_7 = arith.constant 0 : index
    %4 = vector.load %arg2[%c0_4, %c0_5, %c0_6, %c0_7] : memref<4x3x32x84xf32, #tpu.memory_space<vmem>>, vector<1x1x32x84xf32>
    %5 = vector.shape_cast %4 : vector<1x1x32x84xf32> to vector<32x84xf32>
    %cst_8 = arith.constant dense<0.000000e+00> : vector<29x84xf32>
    %6 = tpu.matmul %3, %5, %cst_8 {dimension_numbers = #tpu.dot_dimension_numbers<[1], [0], [0], [1], [0, 0, 1, 1], [], []>} : vector<29x32xf32>, vector<32x84xf32>, vector<29x84xf32> -> vector<29x84xf32>
    %7 = arith.addf %0, %6 : vector<29x84xf32>
    %c0_9 = arith.constant 0 : index
    %c0_10 = arith.constant 0 : index
    %c0_11 = arith.constant 0 : index
    %c0_12 = arith.constant 0 : index
    %8 = vector.load %arg3[%c0_9, %c0_10, %c0_11, %c0_12] : memref<4x3x32x84xf32, #tpu.memory_space<vmem>>, vector<1x1x32x84xf32>
    %9 = vector.shape_cast %8 : vector<1x1x32x84xf32> to vector<32x84xf32>
    %cst_13 = arith.constant dense<0.000000e+00> : vector<29x84xf32>
    %10 = tpu.matmul %3, %9, %cst_13 {dimension_numbers = #tpu.dot_dimension_numbers<[1], [0], [0], [1], [0, 0, 1, 1], [], []>} : vector<29x32xf32>, vector<32x84xf32>, vector<29x84xf32> -> vector<29x84xf32>
    %11 = arith.addf %1, %10 : vector<29x84xf32>
    %c0_14 = arith.constant 0 : index
    %c1 = arith.constant 1 : index
    %c0_15 = arith.constant 0 : index
    %c0_16 = arith.constant 0 : index
    %12 = vector.load %arg1[%c0_14, %c1, %c0_15, %c0_16] : memref<1x3x32x32xf32, #tpu.memory_space<vmem>>, vector<1x1x29x32xf32>
    %13 = vector.shape_cast %12 : vector<1x1x29x32xf32> to vector<29x32xf32>
    %c0_17 = arith.constant 0 : index
    %c1_18 = arith.constant 1 : index
    %c0_19 = arith.constant 0 : index
    %c0_20 = arith.constant 0 : index
    %14 = vector.load %arg2[%c0_17, %c1_18, %c0_19, %c0_20] : memref<4x3x32x84xf32, #tpu.memory_space<vmem>>, vector<1x1x32x84xf32>
    %15 = vector.shape_cast %14 : vector<1x1x32x84xf32> to vector<32x84xf32>
    %cst_21 = arith.constant dense<0.000000e+00> : vector<29x84xf32>
    %16 = tpu.matmul %13, %15, %cst_21 {dimension_numbers = #tpu.dot_dimension_numbers<[1], [0], [0], [1], [0, 0, 1, 1], [], []>} : vector<29x32xf32>, vector<32x84xf32>, vector<29x84xf32> -> vector<29x84xf32>
    %17 = arith.addf %7, %16 : vector<29x84xf32>
    %c0_22 = arith.constant 0 : index
    %c1_23 = arith.constant 1 : index
    %c0_24 = arith.constant 0 : index
    %c0_25 = arith.constant 0 : index
    %18 = vector.load %arg3[%c0_22, %c1_23, %c0_24, %c0_25] : memref<4x3x32x84xf32, #tpu.memory_space<vmem>>, vector<1x1x32x84xf32>
    %19 = vector.shape_cast %18 : vector<1x1x32x84xf32> to vector<32x84xf32>
    %cst_26 = arith.constant dense<0.000000e+00> : vector<29x84xf32>
    %20 = tpu.matmul %13, %19, %cst_26 {dimension_numbers = #tpu.dot_dimension_numbers<[1], [0], [0], [1], [0, 0, 1, 1], [], []>} : vector<29x32xf32>, vector<32x84xf32>, vector<29x84xf32> -> vector<29x84xf32>
    %21 = arith.addf %11, %20 : vector<29x84xf32>
    %c0_27 = arith.constant 0 : index
    %c2 = arith.constant 2 : index
    %c0_28 = arith.constant 0 : index
    %c0_29 = arith.constant 0 : index
    %22 = vector.load %arg1[%c0_27, %c2, %c0_28, %c0_29] : memref<1x3x32x32xf32, #tpu.memory_space<vmem>>, vector<1x1x29x32xf32>
    %23 = vector.shape_cast %22 : vector<1x1x29x32xf32> to vector<29x32xf32>
    %c0_30 = arith.constant 0 : index
    %c2_31 = arith.constant 2 : index
    %c0_32 = arith.constant 0 : index
    %c0_33 = arith.constant 0 : index
    %24 = vector.load %arg2[%c0_30, %c2_31, %c0_32, %c0_33] : memref<4x3x32x84xf32, #tpu.memory_space<vmem>>, vector<1x1x32x84xf32>
    %25 = vector.shape_cast %24 : vector<1x1x32x84xf32> to vector<32x84xf32>
    %cst_34 = arith.constant dense<0.000000e+00> : vector<29x84xf32>
    %26 = tpu.matmul %23, %25, %cst_34 {dimension_numbers = #tpu.dot_dimension_numbers<[1], [0], [0], [1], [0, 0, 1, 1], [], []>} : vector<29x32xf32>, vector<32x84xf32>, vector<29x84xf32> -> vector<29x84xf32>
    %27 = arith.addf %17, %26 : vector<29x84xf32>
    %c0_35 = arith.constant 0 : index
    %c2_36 = arith.constant 2 : index
    %c0_37 = arith.constant 0 : index
    %c0_38 = arith.constant 0 : index
    %28 = vector.load %arg3[%c0_35, %c2_36, %c0_37, %c0_38] : memref<4x3x32x84xf32, #tpu.memory_space<vmem>>, vector<1x1x32x84xf32>
    %29 = vector.shape_cast %28 : vector<1x1x32x84xf32> to vector<32x84xf32>
    %cst_39 = arith.constant dense<0.000000e+00> : vector<29x84xf32>
    %30 = tpu.matmul %23, %29, %cst_39 {dimension_numbers = #tpu.dot_dimension_numbers<[1], [0], [0], [1], [0, 0, 1, 1], [], []>} : vector<29x32xf32>, vector<32x84xf32>, vector<29x84xf32> -> vector<29x84xf32>
    %31 = arith.addf %21, %30 : vector<29x84xf32>
    %c0_40 = arith.constant 0 : index
    %c0_41 = arith.constant 0 : index
    %c1_42 = arith.constant 1 : index
    %c0_43 = arith.constant 0 : index
    %32 = vector.load %arg1[%c0_40, %c0_41, %c1_42, %c0_43] : memref<1x3x32x32xf32, #tpu.memory_space<vmem>>, vector<1x1x29x32xf32>
    %33 = vector.shape_cast %32 : vector<1x1x29x32xf32> to vector<29x32xf32>
    %c1_44 = arith.constant 1 : index
    %c0_45 = arith.constant 0 : index
    %c0_46 = arith.constant 0 : index
    %c0_47 = arith.constant 0 : index
    %34 = vector.load %arg2[%c1_44, %c0_45, %c0_46, %c0_47] : memref<4x3x32x84xf32, #tpu.memory_space<vmem>>, vector<1x1x32x84xf32>
    %35 = vector.shape_cast %34 : vector<1x1x32x84xf32> to vector<32x84xf32>
    %cst_48 = arith.constant dense<0.000000e+00> : vector<29x84xf32>
    %36 = tpu.matmul %33, %35, %cst_48 {dimension_numbers = #tpu.dot_dimension_numbers<[1], [0], [0], [1], [0, 0, 1, 1], [], []>} : vector<29x32xf32>, vector<32x84xf32>, vector<29x84xf32> -> vector<29x84xf32>
    %37 = arith.addf %27, %36 : vector<29x84xf32>
    %c1_49 = arith.constant 1 : index
    %c0_50 = arith.constant 0 : index
    %c0_51 = arith.constant 0 : index
    %c0_52 = arith.constant 0 : index
    %38 = vector.load %arg3[%c1_49, %c0_50, %c0_51, %c0_52] : memref<4x3x32x84xf32, #tpu.memory_space<vmem>>, vector<1x1x32x84xf32>
    %39 = vector.shape_cast %38 : vector<1x1x32x84xf32> to vector<32x84xf32>
    %cst_53 = arith.constant dense<0.000000e+00> : vector<29x84xf32>
    %40 = tpu.matmul %33, %39, %cst_53 {dimension_numbers = #tpu.dot_dimension_numbers<[1], [0], [0], [1], [0, 0, 1, 1], [], []>} : vector<29x32xf32>, vector<32x84xf32>, vector<29x84xf32> -> vector<29x84xf32>
    %41 = arith.addf %31, %40 : vector<29x84xf32>
    %c0_54 = arith.constant 0 : index
    %c1_55 = arith.constant 1 : index
    %c1_56 = arith.constant 1 : index
    %c0_57 = arith.constant 0 : index
    %42 = vector.load %arg1[%c0_54, %c1_55, %c1_56, %c0_57] : memref<1x3x32x32xf32, #tpu.memory_space<vmem>>, vector<1x1x29x32xf32>
    %43 = vector.shape_cast %42 : vector<1x1x29x32xf32> to vector<29x32xf32>
    %c1_58 = arith.constant 1 : index
    %c1_59 = arith.constant 1 : index
    %c0_60 = arith.constant 0 : index
    %c0_61 = arith.constant 0 : index
    %44 = vector.load %arg2[%c1_58, %c1_59, %c0_60, %c0_61] : memref<4x3x32x84xf32, #tpu.memory_space<vmem>>, vector<1x1x32x84xf32>
    %45 = vector.shape_cast %44 : vector<1x1x32x84xf32> to vector<32x84xf32>
    %cst_62 = arith.constant dense<0.000000e+00> : vector<29x84xf32>
    %46 = tpu.matmul %43, %45, %cst_62 {dimension_numbers = #tpu.dot_dimension_numbers<[1], [0], [0], [1], [0, 0, 1, 1], [], []>} : vector<29x32xf32>, vector<32x84xf32>, vector<29x84xf32> -> vector<29x84xf32>
    %47 = arith.addf %37, %46 : vector<29x84xf32>
    %c1_63 = arith.constant 1 : index
    %c1_64 = arith.constant 1 : index
    %c0_65 = arith.constant 0 : index
    %c0_66 = arith.constant 0 : index
    %48 = vector.load %arg3[%c1_63, %c1_64, %c0_65, %c0_66] : memref<4x3x32x84xf32, #tpu.memory_space<vmem>>, vector<1x1x32x84xf32>
    %49 = vector.shape_cast %48 : vector<1x1x32x84xf32> to vector<32x84xf32>
    %cst_67 = arith.constant dense<0.000000e+00> : vector<29x84xf32>
    %50 = tpu.matmul %43, %49, %cst_67 {dimension_numbers = #tpu.dot_dimension_numbers<[1], [0], [0], [1], [0, 0, 1, 1], [], []>} : vector<29x32xf32>, vector<32x84xf32>, vector<29x84xf32> -> vector<29x84xf32>
    %51 = arith.addf %41, %50 : vector<29x84xf32>
    %c0_68 = arith.constant 0 : index
    %c2_69 = arith.constant 2 : index
    %c1_70 = arith.constant 1 : index
    %c0_71 = arith.constant 0 : index
    %52 = vector.load %arg1[%c0_68, %c2_69, %c1_70, %c0_71] : memref<1x3x32x32xf32, #tpu.memory_space<vmem>>, vector<1x1x29x32xf32>
    %53 = vector.shape_cast %52 : vector<1x1x29x32xf32> to vector<29x32xf32>
    %c1_72 = arith.constant 1 : index
    %c2_73 = arith.constant 2 : index
    %c0_74 = arith.constant 0 : index
    %c0_75 = arith.constant 0 : index
    %54 = vector.load %arg2[%c1_72, %c2_73, %c0_74, %c0_75] : memref<4x3x32x84xf32, #tpu.memory_space<vmem>>, vector<1x1x32x84xf32>
    %55 = vector.shape_cast %54 : vector<1x1x32x84xf32> to vector<32x84xf32>
    %cst_76 = arith.constant dense<0.000000e+00> : vector<29x84xf32>
    %56 = tpu.matmul %53, %55, %cst_76 {dimension_numbers = #tpu.dot_dimension_numbers<[1], [0], [0], [1], [0, 0, 1, 1], [], []>} : vector<29x32xf32>, vector<32x84xf32>, vector<29x84xf32> -> vector<29x84xf32>
    %57 = arith.addf %47, %56 : vector<29x84xf32>
    %c1_77 = arith.constant 1 : index
    %c2_78 = arith.constant 2 : index
    %c0_79 = arith.constant 0 : index
    %c0_80 = arith.constant 0 : index
    %58 = vector.load %arg3[%c1_77, %c2_78, %c0_79, %c0_80] : memref<4x3x32x84xf32, #tpu.memory_space<vmem>>, vector<1x1x32x84xf32>
    %59 = vector.shape_cast %58 : vector<1x1x32x84xf32> to vector<32x84xf32>
    %cst_81 = arith.constant dense<0.000000e+00> : vector<29x84xf32>
    %60 = tpu.matmul %53, %59, %cst_81 {dimension_numbers = #tpu.dot_dimension_numbers<[1], [0], [0], [1], [0, 0, 1, 1], [], []>} : vector<29x32xf32>, vector<32x84xf32>, vector<29x84xf32> -> vector<29x84xf32>
    %61 = arith.addf %51, %60 : vector<29x84xf32>
    %c0_82 = arith.constant 0 : index
    %c0_83 = arith.constant 0 : index
    %c2_84 = arith.constant 2 : index
    %c0_85 = arith.constant 0 : index
    %62 = vector.load %arg1[%c0_82, %c0_83, %c2_84, %c0_85] : memref<1x3x32x32xf32, #tpu.memory_space<vmem>>, vector<1x1x29x32xf32>
    %63 = vector.shape_cast %62 : vector<1x1x29x32xf32> to vector<29x32xf32>
    %c2_86 = arith.constant 2 : index
    %c0_87 = arith.constant 0 : index
    %c0_88 = arith.constant 0 : index
    %c0_89 = arith.constant 0 : index
    %64 = vector.load %arg2[%c2_86, %c0_87, %c0_88, %c0_89] : memref<4x3x32x84xf32, #tpu.memory_space<vmem>>, vector<1x1x32x84xf32>
    %65 = vector.shape_cast %64 : vector<1x1x32x84xf32> to vector<32x84xf32>
    %cst_90 = arith.constant dense<0.000000e+00> : vector<29x84xf32>
    %66 = tpu.matmul %63, %65, %cst_90 {dimension_numbers = #tpu.dot_dimension_numbers<[1], [0], [0], [1], [0, 0, 1, 1], [], []>} : vector<29x32xf32>, vector<32x84xf32>, vector<29x84xf32> -> vector<29x84xf32>
    %67 = arith.addf %57, %66 : vector<29x84xf32>
    %c2_91 = arith.constant 2 : index
    %c0_92 = arith.constant 0 : index
    %c0_93 = arith.constant 0 : index
    %c0_94 = arith.constant 0 : index
    %68 = vector.load %arg3[%c2_91, %c0_92, %c0_93, %c0_94] : memref<4x3x32x84xf32, #tpu.memory_space<vmem>>, vector<1x1x32x84xf32>
    %69 = vector.shape_cast %68 : vector<1x1x32x84xf32> to vector<32x84xf32>
    %cst_95 = arith.constant dense<0.000000e+00> : vector<29x84xf32>
    %70 = tpu.matmul %63, %69, %cst_95 {dimension_numbers = #tpu.dot_dimension_numbers<[1], [0], [0], [1], [0, 0, 1, 1], [], []>} : vector<29x32xf32>, vector<32x84xf32>, vector<29x84xf32> -> vector<29x84xf32>
    %71 = arith.addf %61, %70 : vector<29x84xf32>
    %c0_96 = arith.constant 0 : index
    %c1_97 = arith.constant 1 : index
    %c2_98 = arith.constant 2 : index
    %c0_99 = arith.constant 0 : index
    %72 = vector.load %arg1[%c0_96, %c1_97, %c2_98, %c0_99] : memref<1x3x32x32xf32, #tpu.memory_space<vmem>>, vector<1x1x29x32xf32>
    %73 = vector.shape_cast %72 : vector<1x1x29x32xf32> to vector<29x32xf32>
    %c2_100 = arith.constant 2 : index
    %c1_101 = arith.constant 1 : index
    %c0_102 = arith.constant 0 : index
    %c0_103 = arith.constant 0 : index
    %74 = vector.load %arg2[%c2_100, %c1_101, %c0_102, %c0_103] : memref<4x3x32x84xf32, #tpu.memory_space<vmem>>, vector<1x1x32x84xf32>
    %75 = vector.shape_cast %74 : vector<1x1x32x84xf32> to vector<32x84xf32>
    %cst_104 = arith.constant dense<0.000000e+00> : vector<29x84xf32>
    %76 = tpu.matmul %73, %75, %cst_104 {dimension_numbers = #tpu.dot_dimension_numbers<[1], [0], [0], [1], [0, 0, 1, 1], [], []>} : vector<29x32xf32>, vector<32x84xf32>, vector<29x84xf32> -> vector<29x84xf32>
    %77 = arith.addf %67, %76 : vector<29x84xf32>
    %c2_105 = arith.constant 2 : index
    %c1_106 = arith.constant 1 : index
    %c0_107 = arith.constant 0 : index
    %c0_108 = arith.constant 0 : index
    %78 = vector.load %arg3[%c2_105, %c1_106, %c0_107, %c0_108] : memref<4x3x32x84xf32, #tpu.memory_space<vmem>>, vector<1x1x32x84xf32>
    %79 = vector.shape_cast %78 : vector<1x1x32x84xf32> to vector<32x84xf32>
    %cst_109 = arith.constant dense<0.000000e+00> : vector<29x84xf32>
    %80 = tpu.matmul %73, %79, %cst_109 {dimension_numbers = #tpu.dot_dimension_numbers<[1], [0], [0], [1], [0, 0, 1, 1], [], []>} : vector<29x32xf32>, vector<32x84xf32>, vector<29x84xf32> -> vector<29x84xf32>
    %81 = arith.addf %71, %80 : vector<29x84xf32>
    %c0_110 = arith.constant 0 : index
    %c2_111 = arith.constant 2 : index
    %c2_112 = arith.constant 2 : index
    %c0_113 = arith.constant 0 : index
    %82 = vector.load %arg1[%c0_110, %c2_111, %c2_112, %c0_113] : memref<1x3x32x32xf32, #tpu.memory_space<vmem>>, vector<1x1x29x32xf32>
    %83 = vector.shape_cast %82 : vector<1x1x29x32xf32> to vector<29x32xf32>
    %c2_114 = arith.constant 2 : index
    %c2_115 = arith.constant 2 : index
    %c0_116 = arith.constant 0 : index
    %c0_117 = arith.constant 0 : index
    %84 = vector.load %arg2[%c2_114, %c2_115, %c0_116, %c0_117] : memref<4x3x32x84xf32, #tpu.memory_space<vmem>>, vector<1x1x32x84xf32>
    %85 = vector.shape_cast %84 : vector<1x1x32x84xf32> to vector<32x84xf32>
    %cst_118 = arith.constant dense<0.000000e+00> : vector<29x84xf32>
    %86 = tpu.matmul %83, %85, %cst_118 {dimension_numbers = #tpu.dot_dimension_numbers<[1], [0], [0], [1], [0, 0, 1, 1], [], []>} : vector<29x32xf32>, vector<32x84xf32>, vector<29x84xf32> -> vector<29x84xf32>
    %87 = arith.addf %77, %86 : vector<29x84xf32>
    %c2_119 = arith.constant 2 : index
    %c2_120 = arith.constant 2 : index
    %c0_121 = arith.constant 0 : index
    %c0_122 = arith.constant 0 : index
    %88 = vector.load %arg3[%c2_119, %c2_120, %c0_121, %c0_122] : memref<4x3x32x84xf32, #tpu.memory_space<vmem>>, vector<1x1x32x84xf32>
    %89 = vector.shape_cast %88 : vector<1x1x32x84xf32> to vector<32x84xf32>
    %cst_123 = arith.constant dense<0.000000e+00> : vector<29x84xf32>
    %90 = tpu.matmul %83, %89, %cst_123 {dimension_numbers = #tpu.dot_dimension_numbers<[1], [0], [0], [1], [0, 0, 1, 1], [], []>} : vector<29x32xf32>, vector<32x84xf32>, vector<29x84xf32> -> vector<29x84xf32>
    %91 = arith.addf %81, %90 : vector<29x84xf32>
    %c0_124 = arith.constant 0 : index
    %c0_125 = arith.constant 0 : index
    %c3 = arith.constant 3 : index
    %c0_126 = arith.constant 0 : index
    %92 = vector.load %arg1[%c0_124, %c0_125, %c3, %c0_126] : memref<1x3x32x32xf32, #tpu.memory_space<vmem>>, vector<1x1x29x32xf32>
    %93 = vector.shape_cast %92 : vector<1x1x29x32xf32> to vector<29x32xf32>
    %c3_127 = arith.constant 3 : index
    %c0_128 = arith.constant 0 : index
    %c0_129 = arith.constant 0 : index
    %c0_130 = arith.constant 0 : index
    %94 = vector.load %arg2[%c3_127, %c0_128, %c0_129, %c0_130] : memref<4x3x32x84xf32, #tpu.memory_space<vmem>>, vector<1x1x32x84xf32>
    %95 = vector.shape_cast %94 : vector<1x1x32x84xf32> to vector<32x84xf32>
    %cst_131 = arith.constant dense<0.000000e+00> : vector<29x84xf32>
    %96 = tpu.matmul %93, %95, %cst_131 {dimension_numbers = #tpu.dot_dimension_numbers<[1], [0], [0], [1], [0, 0, 1, 1], [], []>} : vector<29x32xf32>, vector<32x84xf32>, vector<29x84xf32> -> vector<29x84xf32>
    %97 = arith.addf %87, %96 : vector<29x84xf32>
    %c3_132 = arith.constant 3 : index
    %c0_133 = arith.constant 0 : index
    %c0_134 = arith.constant 0 : index
    %c0_135 = arith.constant 0 : index
    %98 = vector.load %arg3[%c3_132, %c0_133, %c0_134, %c0_135] : memref<4x3x32x84xf32, #tpu.memory_space<vmem>>, vector<1x1x32x84xf32>
    %99 = vector.shape_cast %98 : vector<1x1x32x84xf32> to vector<32x84xf32>
    %cst_136 = arith.constant dense<0.000000e+00> : vector<29x84xf32>
    %100 = tpu.matmul %93, %99, %cst_136 {dimension_numbers = #tpu.dot_dimension_numbers<[1], [0], [0], [1], [0, 0, 1, 1], [], []>} : vector<29x32xf32>, vector<32x84xf32>, vector<29x84xf32> -> vector<29x84xf32>
    %101 = arith.addf %91, %100 : vector<29x84xf32>
    %c0_137 = arith.constant 0 : index
    %c1_138 = arith.constant 1 : index
    %c3_139 = arith.constant 3 : index
    %c0_140 = arith.constant 0 : index
    %102 = vector.load %arg1[%c0_137, %c1_138, %c3_139, %c0_140] : memref<1x3x32x32xf32, #tpu.memory_space<vmem>>, vector<1x1x29x32xf32>
    %103 = vector.shape_cast %102 : vector<1x1x29x32xf32> to vector<29x32xf32>
    %c3_141 = arith.constant 3 : index
    %c1_142 = arith.constant 1 : index
    %c0_143 = arith.constant 0 : index
    %c0_144 = arith.constant 0 : index
    %104 = vector.load %arg2[%c3_141, %c1_142, %c0_143, %c0_144] : memref<4x3x32x84xf32, #tpu.memory_space<vmem>>, vector<1x1x32x84xf32>
    %105 = vector.shape_cast %104 : vector<1x1x32x84xf32> to vector<32x84xf32>
    %cst_145 = arith.constant dense<0.000000e+00> : vector<29x84xf32>
    %106 = tpu.matmul %103, %105, %cst_145 {dimension_numbers = #tpu.dot_dimension_numbers<[1], [0], [0], [1], [0, 0, 1, 1], [], []>} : vector<29x32xf32>, vector<32x84xf32>, vector<29x84xf32> -> vector<29x84xf32>
    %107 = arith.addf %97, %106 : vector<29x84xf32>
    %c3_146 = arith.constant 3 : index
    %c1_147 = arith.constant 1 : index
    %c0_148 = arith.constant 0 : index
    %c0_149 = arith.constant 0 : index
    %108 = vector.load %arg3[%c3_146, %c1_147, %c0_148, %c0_149] : memref<4x3x32x84xf32, #tpu.memory_space<vmem>>, vector<1x1x32x84xf32>
    %109 = vector.shape_cast %108 : vector<1x1x32x84xf32> to vector<32x84xf32>
    %cst_150 = arith.constant dense<0.000000e+00> : vector<29x84xf32>
    %110 = tpu.matmul %103, %109, %cst_150 {dimension_numbers = #tpu.dot_dimension_numbers<[1], [0], [0], [1], [0, 0, 1, 1], [], []>} : vector<29x32xf32>, vector<32x84xf32>, vector<29x84xf32> -> vector<29x84xf32>
    %111 = arith.addf %101, %110 : vector<29x84xf32>
    %c0_151 = arith.constant 0 : index
    %c2_152 = arith.constant 2 : index
    %c3_153 = arith.constant 3 : index
    %c0_154 = arith.constant 0 : index
    %112 = vector.load %arg1[%c0_151, %c2_152, %c3_153, %c0_154] : memref<1x3x32x32xf32, #tpu.memory_space<vmem>>, vector<1x1x29x32xf32>
    %113 = vector.shape_cast %112 : vector<1x1x29x32xf32> to vector<29x32xf32>
    %c3_155 = arith.constant 3 : index
    %c2_156 = arith.constant 2 : index
    %c0_157 = arith.constant 0 : index
    %c0_158 = arith.constant 0 : index
    %114 = vector.load %arg2[%c3_155, %c2_156, %c0_157, %c0_158] : memref<4x3x32x84xf32, #tpu.memory_space<vmem>>, vector<1x1x32x84xf32>
    %115 = vector.shape_cast %114 : vector<1x1x32x84xf32> to vector<32x84xf32>
    %cst_159 = arith.constant dense<0.000000e+00> : vector<29x84xf32>
    %116 = tpu.matmul %113, %115, %cst_159 {dimension_numbers = #tpu.dot_dimension_numbers<[1], [0], [0], [1], [0, 0, 1, 1], [], []>} : vector<29x32xf32>, vector<32x84xf32>, vector<29x84xf32> -> vector<29x84xf32>
    %117 = arith.addf %107, %116 : vector<29x84xf32>
    %c3_160 = arith.constant 3 : index
    %c2_161 = arith.constant 2 : index
    %c0_162 = arith.constant 0 : index
    %c0_163 = arith.constant 0 : index
    %118 = vector.load %arg3[%c3_160, %c2_161, %c0_162, %c0_163] : memref<4x3x32x84xf32, #tpu.memory_space<vmem>>, vector<1x1x32x84xf32>
    %119 = vector.shape_cast %118 : vector<1x1x32x84xf32> to vector<32x84xf32>
    %cst_164 = arith.constant dense<0.000000e+00> : vector<29x84xf32>
    %120 = tpu.matmul %113, %119, %cst_164 {dimension_numbers = #tpu.dot_dimension_numbers<[1], [0], [0], [1], [0, 0, 1, 1], [], []>} : vector<29x32xf32>, vector<32x84xf32>, vector<29x84xf32> -> vector<29x84xf32>
    %121 = arith.addf %111, %120 : vector<29x84xf32>
    %122 = arith.maximumf %117, %121 : vector<29x84xf32>
    %c0_165 = arith.constant 0 : index
    %c0_166 = arith.constant 0 : index
    %123 = vector.load %arg4[%c0_165, %c0_166] : memref<1x84xf32, #tpu.memory_space<vmem>>, vector<1x84xf32>
    %124 = vector.broadcast %123 : vector<1x84xf32> to vector<29x84xf32>
    %125 = arith.addf %122, %124 : vector<29x84xf32>
    %cst_167 = arith.constant 0.000000e+00 : f32
    %126 = vector.broadcast %cst_167 : f32 to vector<29x84xf32>
    %127 = arith.maximumf %125, %126 : vector<29x84xf32>
    %128 = tpu.iota {dimensions = array<i32: 0>} : vector<14x29xi32>
    %129 = tpu.iota {dimensions = array<i32: 1>} : vector<14x29xi32>
    %c2_i32 = arith.constant 2 : i32
    %130 = vector.broadcast %c2_i32 : i32 to vector<14x29xi32>
    %131 = arith.muli %130, %128 : vector<14x29xi32>
    %132 = arith.cmpi eq, %129, %131 : vector<14x29xi32>
    %133 = arith.extui %132 : vector<14x29xi1> to vector<14x29xi32>
    %134 = arith.sitofp %133 : vector<14x29xi32> to vector<14x29xf32>
    %c2_i32_168 = arith.constant 2 : i32
    %135 = vector.broadcast %c2_i32_168 : i32 to vector<14x29xi32>
    %136 = arith.muli %135, %128 : vector<14x29xi32>
    %c1_i32 = arith.constant 1 : i32
    %137 = vector.broadcast %c1_i32 : i32 to vector<14x29xi32>
    %138 = arith.addi %136, %137 : vector<14x29xi32>
    %139 = arith.cmpi eq, %129, %138 : vector<14x29xi32>
    %140 = arith.extui %139 : vector<14x29xi1> to vector<14x29xi32>
    %141 = arith.sitofp %140 : vector<14x29xi32> to vector<14x29xf32>
    %cst_169 = arith.constant dense<0.000000e+00> : vector<14x84xf32>
    %142 = tpu.matmul %134, %127, %cst_169 {dimension_numbers = #tpu.dot_dimension_numbers<[1], [0], [0], [1], [0, 0, 1, 1], [], []>} : vector<14x29xf32>, vector<29x84xf32>, vector<14x84xf32> -> vector<14x84xf32>
    %cst_170 = arith.constant dense<0.000000e+00> : vector<14x84xf32>
    %143 = tpu.matmul %141, %127, %cst_170 {dimension_numbers = #tpu.dot_dimension_numbers<[1], [0], [0], [1], [0, 0, 1, 1], [], []>} : vector<14x29xf32>, vector<29x84xf32>, vector<14x84xf32> -> vector<14x84xf32>
    %144 = arith.maximumf %142, %143 : vector<14x84xf32>
    %c0_171 = arith.constant 0 : index
    %c0_172 = arith.constant 0 : index
    %145 = vector.load %arg13[%c0_171, %c0_172] : memref<14x84xf32, #tpu.memory_space<vmem>>, vector<14x84xf32>
    tpu.vector_store %arg13[%c0_171, %c0_172], %144 {strides = array<i32>} : memref<14x84xf32, #tpu.memory_space<vmem>>, vector<14x84xf32>,
    %cst_173 = arith.constant 0.000000e+00 : f32
    %146 = vector.broadcast %cst_173 : f32 to vector<10x45xf32>
    %cst_174 = arith.constant 0.000000e+00 : f32
    %147 = vector.broadcast %cst_174 : f32 to vector<10x45xf32>
    %c0_175 = arith.constant 0 : index
    %c0_176 = arith.constant 0 : index
    %148 = vector.load %arg13[%c0_175, %c0_176] : memref<14x84xf32, #tpu.memory_space<vmem>>, vector<10x84xf32>
    %c0_177 = arith.constant 0 : index
    %c0_178 = arith.constant 0 : index
    %c0_179 = arith.constant 0 : index
    %149 = vector.load %arg5[%c0_177, %c0_178, %c0_179] : memref<5x84x45xf32, #tpu.memory_space<vmem>>, vector<1x84x45xf32>
    %150 = vector.shape_cast %149 : vector<1x84x45xf32> to vector<84x45xf32>
    %cst_180 = arith.constant dense<0.000000e+00> : vector<10x45xf32>
    %151 = tpu.matmul %148, %150, %cst_180 {dimension_numbers = #tpu.dot_dimension_numbers<[1], [0], [0], [1], [0, 0, 1, 1], [], []>} : vector<10x84xf32>, vector<84x45xf32>, vector<10x45xf32> -> vector<10x45xf32>
    %152 = arith.addf %146, %151 : vector<10x45xf32>
    %c0_181 = arith.constant 0 : index
    %c0_182 = arith.constant 0 : index
    %c0_183 = arith.constant 0 : index
    %153 = vector.load %arg6[%c0_181, %c0_182, %c0_183] : memref<5x84x45xf32, #tpu.memory_space<vmem>>, vector<1x84x45xf32>
    %154 = vector.shape_cast %153 : vector<1x84x45xf32> to vector<84x45xf32>
    %cst_184 = arith.constant dense<0.000000e+00> : vector<10x45xf32>
    %155 = tpu.matmul %148, %154, %cst_184 {dimension_numbers = #tpu.dot_dimension_numbers<[1], [0], [0], [1], [0, 0, 1, 1], [], []>} : vector<10x84xf32>, vector<84x45xf32>, vector<10x45xf32> -> vector<10x45xf32>
    %156 = arith.addf %147, %155 : vector<10x45xf32>
    %c1_185 = arith.constant 1 : index
    %c0_186 = arith.constant 0 : index
    %157 = vector.load %arg13[%c1_185, %c0_186] : memref<14x84xf32, #tpu.memory_space<vmem>>, vector<10x84xf32>
    %c1_187 = arith.constant 1 : index
    %c0_188 = arith.constant 0 : index
    %c0_189 = arith.constant 0 : index
    %158 = vector.load %arg5[%c1_187, %c0_188, %c0_189] : memref<5x84x45xf32, #tpu.memory_space<vmem>>, vector<1x84x45xf32>
    %159 = vector.shape_cast %158 : vector<1x84x45xf32> to vector<84x45xf32>
    %cst_190 = arith.constant dense<0.000000e+00> : vector<10x45xf32>
    %160 = tpu.matmul %157, %159, %cst_190 {dimension_numbers = #tpu.dot_dimension_numbers<[1], [0], [0], [1], [0, 0, 1, 1], [], []>} : vector<10x84xf32>, vector<84x45xf32>, vector<10x45xf32> -> vector<10x45xf32>
    %161 = arith.addf %152, %160 : vector<10x45xf32>
    %c1_191 = arith.constant 1 : index
    %c0_192 = arith.constant 0 : index
    %c0_193 = arith.constant 0 : index
    %162 = vector.load %arg6[%c1_191, %c0_192, %c0_193] : memref<5x84x45xf32, #tpu.memory_space<vmem>>, vector<1x84x45xf32>
    %163 = vector.shape_cast %162 : vector<1x84x45xf32> to vector<84x45xf32>
    %cst_194 = arith.constant dense<0.000000e+00> : vector<10x45xf32>
    %164 = tpu.matmul %157, %163, %cst_194 {dimension_numbers = #tpu.dot_dimension_numbers<[1], [0], [0], [1], [0, 0, 1, 1], [], []>} : vector<10x84xf32>, vector<84x45xf32>, vector<10x45xf32> -> vector<10x45xf32>
    %165 = arith.addf %156, %164 : vector<10x45xf32>
    %c2_195 = arith.constant 2 : index
    %c0_196 = arith.constant 0 : index
    %166 = vector.load %arg13[%c2_195, %c0_196] : memref<14x84xf32, #tpu.memory_space<vmem>>, vector<10x84xf32>
    %c2_197 = arith.constant 2 : index
    %c0_198 = arith.constant 0 : index
    %c0_199 = arith.constant 0 : index
    %167 = vector.load %arg5[%c2_197, %c0_198, %c0_199] : memref<5x84x45xf32, #tpu.memory_space<vmem>>, vector<1x84x45xf32>
    %168 = vector.shape_cast %167 : vector<1x84x45xf32> to vector<84x45xf32>
    %cst_200 = arith.constant dense<0.000000e+00> : vector<10x45xf32>
    %169 = tpu.matmul %166, %168, %cst_200 {dimension_numbers = #tpu.dot_dimension_numbers<[1], [0], [0], [1], [0, 0, 1, 1], [], []>} : vector<10x84xf32>, vector<84x45xf32>, vector<10x45xf32> -> vector<10x45xf32>
    %170 = arith.addf %161, %169 : vector<10x45xf32>
    %c2_201 = arith.constant 2 : index
    %c0_202 = arith.constant 0 : index
    %c0_203 = arith.constant 0 : index
    %171 = vector.load %arg6[%c2_201, %c0_202, %c0_203] : memref<5x84x45xf32, #tpu.memory_space<vmem>>, vector<1x84x45xf32>
    %172 = vector.shape_cast %171 : vector<1x84x45xf32> to vector<84x45xf32>
    %cst_204 = arith.constant dense<0.000000e+00> : vector<10x45xf32>
    %173 = tpu.matmul %166, %172, %cst_204 {dimension_numbers = #tpu.dot_dimension_numbers<[1], [0], [0], [1], [0, 0, 1, 1], [], []>} : vector<10x84xf32>, vector<84x45xf32>, vector<10x45xf32> -> vector<10x45xf32>
    %174 = arith.addf %165, %173 : vector<10x45xf32>
    %c3_205 = arith.constant 3 : index
    %c0_206 = arith.constant 0 : index
    %175 = vector.load %arg13[%c3_205, %c0_206] : memref<14x84xf32, #tpu.memory_space<vmem>>, vector<10x84xf32>
    %c3_207 = arith.constant 3 : index
    %c0_208 = arith.constant 0 : index
    %c0_209 = arith.constant 0 : index
    %176 = vector.load %arg5[%c3_207, %c0_208, %c0_209] : memref<5x84x45xf32, #tpu.memory_space<vmem>>, vector<1x84x45xf32>
    %177 = vector.shape_cast %176 : vector<1x84x45xf32> to vector<84x45xf32>
    %cst_210 = arith.constant dense<0.000000e+00> : vector<10x45xf32>
    %178 = tpu.matmul %175, %177, %cst_210 {dimension_numbers = #tpu.dot_dimension_numbers<[1], [0], [0], [1], [0, 0, 1, 1], [], []>} : vector<10x84xf32>, vector<84x45xf32>, vector<10x45xf32> -> vector<10x45xf32>
    %179 = arith.addf %170, %178 : vector<10x45xf32>
    %c3_211 = arith.constant 3 : index
    %c0_212 = arith.constant 0 : index
    %c0_213 = arith.constant 0 : index
    %180 = vector.load %arg6[%c3_211, %c0_212, %c0_213] : memref<5x84x45xf32, #tpu.memory_space<vmem>>, vector<1x84x45xf32>
    %181 = vector.shape_cast %180 : vector<1x84x45xf32> to vector<84x45xf32>
    %cst_214 = arith.constant dense<0.000000e+00> : vector<10x45xf32>
    %182 = tpu.matmul %175, %181, %cst_214 {dimension_numbers = #tpu.dot_dimension_numbers<[1], [0], [0], [1], [0, 0, 1, 1], [], []>} : vector<10x84xf32>, vector<84x45xf32>, vector<10x45xf32> -> vector<10x45xf32>
    %183 = arith.addf %174, %182 : vector<10x45xf32>
    %c4 = arith.constant 4 : index
    %c0_215 = arith.constant 0 : index
    %184 = vector.load %arg13[%c4, %c0_215] : memref<14x84xf32, #tpu.memory_space<vmem>>, vector<10x84xf32>
    %c4_216 = arith.constant 4 : index
    %c0_217 = arith.constant 0 : index
    %c0_218 = arith.constant 0 : index
    %185 = vector.load %arg5[%c4_216, %c0_217, %c0_218] : memref<5x84x45xf32, #tpu.memory_space<vmem>>, vector<1x84x45xf32>
    %186 = vector.shape_cast %185 : vector<1x84x45xf32> to vector<84x45xf32>
    %cst_219 = arith.constant dense<0.000000e+00> : vector<10x45xf32>
    %187 = tpu.matmul %184, %186, %cst_219 {dimension_numbers = #tpu.dot_dimension_numbers<[1], [0], [0], [1], [0, 0, 1, 1], [], []>} : vector<10x84xf32>, vector<84x45xf32>, vector<10x45xf32> -> vector<10x45xf32>
    %188 = arith.addf %179, %187 : vector<10x45xf32>
    %c4_220 = arith.constant 4 : index
    %c0_221 = arith.constant 0 : index
    %c0_222 = arith.constant 0 : index
    %189 = vector.load %arg6[%c4_220, %c0_221, %c0_222] : memref<5x84x45xf32, #tpu.memory_space<vmem>>, vector<1x84x45xf32>
    %190 = vector.shape_cast %189 : vector<1x84x45xf32> to vector<84x45xf32>
    %cst_223 = arith.constant dense<0.000000e+00> : vector<10x45xf32>
    %191 = tpu.matmul %184, %190, %cst_223 {dimension_numbers = #tpu.dot_dimension_numbers<[1], [0], [0], [1], [0, 0, 1, 1], [], []>} : vector<10x84xf32>, vector<84x45xf32>, vector<10x45xf32> -> vector<10x45xf32>
    %192 = arith.addf %183, %191 : vector<10x45xf32>
    %193 = arith.maximumf %188, %192 : vector<10x45xf32>
    %c0_224 = arith.constant 0 : index
    %c0_225 = arith.constant 0 : index
    %194 = vector.load %arg7[%c0_224, %c0_225] : memref<1x45xf32, #tpu.memory_space<vmem>>, vector<1x45xf32>
    %195 = vector.broadcast %194 : vector<1x45xf32> to vector<10x45xf32>
    %196 = arith.addf %193, %195 : vector<10x45xf32>
    %cst_226 = arith.constant 0.000000e+00 : f32
    %197 = vector.broadcast %cst_226 : f32 to vector<10x45xf32>
    %198 = arith.maximumf %196, %197 : vector<10x45xf32>
    %199 = tpu.iota {dimensions = array<i32: 0>} : vector<5x10xi32>
    %200 = tpu.iota {dimensions = array<i32: 1>} : vector<5x10xi32>
    %c2_i32_227 = arith.constant 2 : i32
    %201 = vector.broadcast %c2_i32_227 : i32 to vector<5x10xi32>
    %202 = arith.muli %201, %199 : vector<5x10xi32>
    %203 = arith.cmpi eq, %200, %202 : vector<5x10xi32>
    %204 = arith.extui %203 : vector<5x10xi1> to vector<5x10xi32>
    %205 = arith.sitofp %204 : vector<5x10xi32> to vector<5x10xf32>
    %c2_i32_228 = arith.constant 2 : i32
    %206 = vector.broadcast %c2_i32_228 : i32 to vector<5x10xi32>
    %207 = arith.muli %206, %199 : vector<5x10xi32>
    %c1_i32_229 = arith.constant 1 : i32
    %208 = vector.broadcast %c1_i32_229 : i32 to vector<5x10xi32>
    %209 = arith.addi %207, %208 : vector<5x10xi32>
    %210 = arith.cmpi eq, %200, %209 : vector<5x10xi32>
    %211 = arith.extui %210 : vector<5x10xi1> to vector<5x10xi32>
    %212 = arith.sitofp %211 : vector<5x10xi32> to vector<5x10xf32>
    %cst_230 = arith.constant dense<0.000000e+00> : vector<5x45xf32>
    %213 = tpu.matmul %205, %198, %cst_230 {dimension_numbers = #tpu.dot_dimension_numbers<[1], [0], [0], [1], [0, 0, 1, 1], [], []>} : vector<5x10xf32>, vector<10x45xf32>, vector<5x45xf32> -> vector<5x45xf32>
    %cst_231 = arith.constant dense<0.000000e+00> : vector<5x45xf32>
    %214 = tpu.matmul %212, %198, %cst_231 {dimension_numbers = #tpu.dot_dimension_numbers<[1], [0], [0], [1], [0, 0, 1, 1], [], []>} : vector<5x10xf32>, vector<10x45xf32>, vector<5x45xf32> -> vector<5x45xf32>
    %215 = arith.maximumf %213, %214 : vector<5x45xf32>
    %c0_232 = arith.constant 0 : index
    %c0_233 = arith.constant 0 : index
    %216 = vector.load %arg14[%c0_232, %c0_233] : memref<5x45xf32, #tpu.memory_space<vmem>>, vector<5x45xf32>
    tpu.vector_store %arg14[%c0_232, %c0_233], %215 {strides = array<i32>} : memref<5x45xf32, #tpu.memory_space<vmem>>, vector<5x45xf32>,
    %c0_234 = arith.constant 0 : index
    %c0_235 = arith.constant 0 : index
    %217 = vector.load %arg9[%c0_234, %c0_235] : memref<1x80xf32, #tpu.memory_space<vmem>>, vector<1x80xf32>
    %c0_236 = arith.constant 0 : index
    %c0_237 = arith.constant 0 : index
    %218 = vector.load %arg14[%c0_236, %c0_237] : memref<5x45xf32, #tpu.memory_space<vmem>>, vector<1x45xf32>
    %c0_238 = arith.constant 0 : index
    %c0_239 = arith.constant 0 : index
    %c0_240 = arith.constant 0 : index
    %219 = vector.load %arg8[%c0_238, %c0_239, %c0_240] : memref<5x45x80xf32, #tpu.memory_space<vmem>>, vector<1x45x80xf32>
    %220 = vector.shape_cast %219 : vector<1x45x80xf32> to vector<45x80xf32>
    %cst_241 = arith.constant dense<0.000000e+00> : vector<1x80xf32>
    %221 = tpu.matmul %218, %220, %cst_241 {dimension_numbers = #tpu.dot_dimension_numbers<[1], [0], [0], [1], [0, 0, 1, 1], [], []>} : vector<1x45xf32>, vector<45x80xf32>, vector<1x80xf32> -> vector<1x80xf32>
    %222 = arith.addf %217, %221 : vector<1x80xf32>
    %c1_242 = arith.constant 1 : index
    %c0_243 = arith.constant 0 : index
    %223 = vector.load %arg14[%c1_242, %c0_243] : memref<5x45xf32, #tpu.memory_space<vmem>>, vector<1x45xf32>
    %c1_244 = arith.constant 1 : index
    %c0_245 = arith.constant 0 : index
    %c0_246 = arith.constant 0 : index
    %224 = vector.load %arg8[%c1_244, %c0_245, %c0_246] : memref<5x45x80xf32, #tpu.memory_space<vmem>>, vector<1x45x80xf32>
    %225 = vector.shape_cast %224 : vector<1x45x80xf32> to vector<45x80xf32>
    %cst_247 = arith.constant dense<0.000000e+00> : vector<1x80xf32>
    %226 = tpu.matmul %223, %225, %cst_247 {dimension_numbers = #tpu.dot_dimension_numbers<[1], [0], [0], [1], [0, 0, 1, 1], [], []>} : vector<1x45xf32>, vector<45x80xf32>, vector<1x80xf32> -> vector<1x80xf32>
    %227 = arith.addf %222, %226 : vector<1x80xf32>
    %c2_248 = arith.constant 2 : index
    %c0_249 = arith.constant 0 : index
    %228 = vector.load %arg14[%c2_248, %c0_249] : memref<5x45xf32, #tpu.memory_space<vmem>>, vector<1x45xf32>
    %c2_250 = arith.constant 2 : index
    %c0_251 = arith.constant 0 : index
    %c0_252 = arith.constant 0 : index
    %229 = vector.load %arg8[%c2_250, %c0_251, %c0_252] : memref<5x45x80xf32, #tpu.memory_space<vmem>>, vector<1x45x80xf32>
    %230 = vector.shape_cast %229 : vector<1x45x80xf32> to vector<45x80xf32>
    %cst_253 = arith.constant dense<0.000000e+00> : vector<1x80xf32>
    %231 = tpu.matmul %228, %230, %cst_253 {dimension_numbers = #tpu.dot_dimension_numbers<[1], [0], [0], [1], [0, 0, 1, 1], [], []>} : vector<1x45xf32>, vector<45x80xf32>, vector<1x80xf32> -> vector<1x80xf32>
    %232 = arith.addf %227, %231 : vector<1x80xf32>
    %c3_254 = arith.constant 3 : index
    %c0_255 = arith.constant 0 : index
    %233 = vector.load %arg14[%c3_254, %c0_255] : memref<5x45xf32, #tpu.memory_space<vmem>>, vector<1x45xf32>
    %c3_256 = arith.constant 3 : index
    %c0_257 = arith.constant 0 : index
    %c0_258 = arith.constant 0 : index
    %234 = vector.load %arg8[%c3_256, %c0_257, %c0_258] : memref<5x45x80xf32, #tpu.memory_space<vmem>>, vector<1x45x80xf32>
    %235 = vector.shape_cast %234 : vector<1x45x80xf32> to vector<45x80xf32>
    %cst_259 = arith.constant dense<0.000000e+00> : vector<1x80xf32>
    %236 = tpu.matmul %233, %235, %cst_259 {dimension_numbers = #tpu.dot_dimension_numbers<[1], [0], [0], [1], [0, 0, 1, 1], [], []>} : vector<1x45xf32>, vector<45x80xf32>, vector<1x80xf32> -> vector<1x80xf32>
    %237 = arith.addf %232, %236 : vector<1x80xf32>
    %c4_260 = arith.constant 4 : index
    %c0_261 = arith.constant 0 : index
    %238 = vector.load %arg14[%c4_260, %c0_261] : memref<5x45xf32, #tpu.memory_space<vmem>>, vector<1x45xf32>
    %c4_262 = arith.constant 4 : index
    %c0_263 = arith.constant 0 : index
    %c0_264 = arith.constant 0 : index
    %239 = vector.load %arg8[%c4_262, %c0_263, %c0_264] : memref<5x45x80xf32, #tpu.memory_space<vmem>>, vector<1x45x80xf32>
    %240 = vector.shape_cast %239 : vector<1x45x80xf32> to vector<45x80xf32>
    %cst_265 = arith.constant dense<0.000000e+00> : vector<1x80xf32>
    %241 = tpu.matmul %238, %240, %cst_265 {dimension_numbers = #tpu.dot_dimension_numbers<[1], [0], [0], [1], [0, 0, 1, 1], [], []>} : vector<1x45xf32>, vector<45x80xf32>, vector<1x80xf32> -> vector<1x80xf32>
    %242 = arith.addf %237, %241 : vector<1x80xf32>
    %cst_266 = arith.constant 0.000000e+00 : f32
    %243 = vector.broadcast %cst_266 : f32 to vector<1x80xf32>
    %244 = arith.maximumf %242, %243 : vector<1x80xf32>
    %c0_267 = arith.constant 0 : index
    %c0_268 = arith.constant 0 : index
    %245 = vector.load %arg10[%c0_267, %c0_268] : memref<80x10xf32, #tpu.memory_space<vmem>>, vector<80x10xf32>
    %cst_269 = arith.constant dense<0.000000e+00> : vector<1x10xf32>
    %246 = tpu.matmul %244, %245, %cst_269 {dimension_numbers = #tpu.dot_dimension_numbers<[1], [0], [0], [1], [0, 0, 1, 1], [], []>} : vector<1x80xf32>, vector<80x10xf32>, vector<1x10xf32> -> vector<1x10xf32>
    %c0_270 = arith.constant 0 : index
    %c0_271 = arith.constant 0 : index
    %247 = vector.load %arg11[%c0_270, %c0_271] : memref<1x10xf32, #tpu.memory_space<vmem>>, vector<1x10xf32>
    %248 = arith.addf %246, %247 : vector<1x10xf32>
    %c0_272 = arith.constant 0 : index
    %c0_273 = arith.constant 0 : index
    %c0_274 = arith.constant 0 : index
    %249 = vector.load %arg12[%c0_272, %c0_273, %c0_274] : memref<1x1x10xf32, #tpu.memory_space<vmem>>, vector<1x1x10xf32>
    %250 = vector.shape_cast %249 : vector<1x1x10xf32> to vector<1x10xf32>
    %251 = vector.shape_cast %248 : vector<1x10xf32> to vector<1x1x10xf32>
    tpu.vector_store %arg12[%c0_272, %c0_273, %c0_274], %251 {strides = array<i32>} : memref<1x1x10xf32, #tpu.memory_space<vmem>>, vector<1x1x10xf32>,
    return
  }
  func.func @transform_0(%arg0: i32) -> (i32, i32, i32, i32) {
    %c0_i32 = arith.constant 0 : i32
    %c0_i32_0 = arith.constant 0 : i32
    %c0_i32_1 = arith.constant 0 : i32
    %c0_i32_2 = arith.constant 0 : i32
    return %arg0, %c0_i32, %c0_i32_0, %c0_i32_1 : i32, i32, i32, i32
  }
  func.func @transform_1(%arg0: i32) -> (i32, i32, i32, i32) {
    %c0_i32 = arith.constant 0 : i32
    %c0_i32_0 = arith.constant 0 : i32
    %c0_i32_1 = arith.constant 0 : i32
    %c0_i32_2 = arith.constant 0 : i32
    %c0_i32_3 = arith.constant 0 : i32
    return %c0_i32, %c0_i32_0, %c0_i32_1, %c0_i32_2 : i32, i32, i32, i32
  }
  func.func @transform_2(%arg0: i32) -> (i32, i32, i32, i32) {
    %c0_i32 = arith.constant 0 : i32
    %c0_i32_0 = arith.constant 0 : i32
    %c0_i32_1 = arith.constant 0 : i32
    %c0_i32_2 = arith.constant 0 : i32
    %c0_i32_3 = arith.constant 0 : i32
    return %c0_i32, %c0_i32_0, %c0_i32_1, %c0_i32_2 : i32, i32, i32, i32
  }
  func.func @transform_3(%arg0: i32) -> (i32, i32) {
    %c0_i32 = arith.constant 0 : i32
    %c0_i32_0 = arith.constant 0 : i32
    %c0_i32_1 = arith.constant 0 : i32
    return %c0_i32, %c0_i32_0 : i32, i32
  }
  func.func @transform_4(%arg0: i32) -> (i32, i32, i32) {
    %c0_i32 = arith.constant 0 : i32
    %c0_i32_0 = arith.constant 0 : i32
    %c0_i32_1 = arith.constant 0 : i32
    %c0_i32_2 = arith.constant 0 : i32
    return %c0_i32, %c0_i32_0, %c0_i32_1 : i32, i32, i32
  }
  func.func @transform_5(%arg0: i32) -> (i32, i32, i32) {
    %c0_i32 = arith.constant 0 : i32
    %c0_i32_0 = arith.constant 0 : i32
    %c0_i32_1 = arith.constant 0 : i32
    %c0_i32_2 = arith.constant 0 : i32
    return %c0_i32, %c0_i32_0, %c0_i32_1 : i32, i32, i32
  }
  func.func @transform_6(%arg0: i32) -> (i32, i32) {
    %c0_i32 = arith.constant 0 : i32
    %c0_i32_0 = arith.constant 0 : i32
    %c0_i32_1 = arith.constant 0 : i32
    return %c0_i32, %c0_i32_0 : i32, i32
  }
  func.func @transform_7(%arg0: i32) -> (i32, i32, i32) {
    %c0_i32 = arith.constant 0 : i32
    %c0_i32_0 = arith.constant 0 : i32
    %c0_i32_1 = arith.constant 0 : i32
    %c0_i32_2 = arith.constant 0 : i32
    return %c0_i32, %c0_i32_0, %c0_i32_1 : i32, i32, i32
  }
  func.func @transform_8(%arg0: i32) -> (i32, i32) {
    %c0_i32 = arith.constant 0 : i32
    %c0_i32_0 = arith.constant 0 : i32
    %c0_i32_1 = arith.constant 0 : i32
    return %c0_i32, %c0_i32_0 : i32, i32
  }
  func.func @transform_9(%arg0: i32) -> (i32, i32) {
    %c0_i32 = arith.constant 0 : i32
    %c0_i32_0 = arith.constant 0 : i32
    %c0_i32_1 = arith.constant 0 : i32
    return %c0_i32, %c0_i32_0 : i32, i32
  }
  func.func @transform_10(%arg0: i32) -> (i32, i32) {
    %c0_i32 = arith.constant 0 : i32
    %c0_i32_0 = arith.constant 0 : i32
    %c0_i32_1 = arith.constant 0 : i32
    return %c0_i32, %c0_i32_0 : i32, i32
  }
  func.func @transform_11(%arg0: i32) -> (i32, i32, i32) {
    %c0_i32 = arith.constant 0 : i32
    %c0_i32_0 = arith.constant 0 : i32
    %c0_i32_1 = arith.constant 0 : i32
    return %arg0, %c0_i32, %c0_i32_0 : i32, i32, i32
  }
}

</mosaic_0001>

<bundles_post_ra>
// kernel: conv_model_forward.1
= control target key start
LH: loop header
LB: loop body
LE: loop exit
PB: predicated region body
PF: predicated region fallthrough
CT: control target
= control target key end

     0   :  { %16 = vsyncpa [#allocation5], 0  ;;  %s8287_s0 = inlined_call_operand.hbm [shape: f32[2,3,32,32], index: 0, kind: input, shape index: {}]   ;;  %s8288_s1 = inlined_call_operand.vmem [shape: f32[4,3,32,84], index: 1, kind: input, shape index: {}]   ;;  %s8289_s2 = inlined_call_operand.vmem [shape: f32[4,3,32,84], index: 2, kind: input, shape index: {}]   ;;  %s8290_s3 = inlined_call_operand.vmem [shape: f32[1,84], index: 3, kind: input, shape index: {}]   ;;  %s8291_s4 = inlined_call_operand.vmem [shape: f32[5,84,45], index: 4, kind: input, shape index: {}]   ;;  %s8292_s5 = inlined_call_operand.vmem [shape: f32[5,84,45], index: 5, kind: input, shape index: {}]   ;;  %s8293_s6 = inlined_call_operand.vmem [shape: f32[1,45], index: 6, kind: input, shape index: {}]   ;;  %s8294_s7 = inlined_call_operand.vmem [shape: f32[5,45,80], index: 7, kind: input, shape index: {}]   ;;  %s8295_s8 = inlined_call_operand.vmem [shape: f32[1,80], index: 8, kind: input, shape index: {}]   ;;  %s8296_s9 = inlined_call_operand.vmem [shape: f32[80,10], index: 9, kind: input, shape index: {}]   ;;  %s8297_s10 = inlined_call_operand.vmem [shape: f32[1,10], index: 10, kind: input, shape index: {}]   ;;  %s8298_s11 = inlined_call_operand.hbm [shape: f32[2,1,10], index: 11, kind: output, shape index: {}]  }
   0x1   :  { %18 = vsyncpa [#allocation5 + $0x1], 0 }
   0x2   :  { %19 = vsyncpa [#allocation6], 0 }
   0x3   :  { %21 = vsyncpa [#allocation6 + $0x1], 0  ;;  %s7077_s17 = smov 0   ;;  %s7079_s18 = smov 0  }
   0x4   :  { %s7081_s19 = smov 0   ;;  %s7083_s20 = smov 0  }
   0x5 LB: > { %8304 = sst [smem:[#allocation10_spill]] %s7003_s19  ;;  %s7098_s21 = sadd.s32 4294967295, %s7007_s20   ;;  %s7007_s20 = sphi %s7083_s20, %s8320_s20   ;;  %s7003_s19 = sphi %s7081_s19, %s8322_s19   ;;  %s6999_s18 = sphi %s7079_s18, %s8324_s18   ;;  %s6995_s17 = sphi %s7077_s17, %s8323_s17  }
   0x6   : > { %s4759_s22 = sadd.s32 4294967294, %s7007_s20   ;;  %s7102_s23 = sadd.s32 1, %s7007_s20  }
   0x7   : > { %8305 = sst [smem:[#allocation11_spill]] %s7102_s23  ;;  %s34_s24 = sadd.s32 1, %s7003_s19 }
   0x8   : > { %s31_s25 = ssub.s32 %s7007_s20, %s7102_s23  ;;  %p41_p0 = scmp.ne.s32.totalorder %s7003_s19, %s6999_s18 }
   0x9   : > { %p32_p1 = scmp.eq.s32.totalorder %s31_s25, 0  ;;  %p42_p2 = scmp.eq.s32.totalorder %s7007_s20, 0 }
   0xa   : > { %p47_p3 = scmp.ne.s32.totalorder %s6999_s18, %s6995_s17  ;;  %p48_p4 = scmp.eq.s32.totalorder %s7098_s21, 0 }
   0xb   : > { %s7114_s26 = scalar_select %p32_p1, %s7003_s19, %s34_s24  }
   0xc   : > { %p43_p5 = por %p42_p2, %p41_p0  ;;  %p7116_p6 = por %p48_p4, %p47_p3 }
   0xd   : > { %8306 = sst [smem:[#allocation12_spill]] %s7114_s26  ;;  %p281_p7 = scmp.eq.s32.totalorder %s7098_s21, 1 }
   0xe   : > { %p287_p8 = scmp.eq.s32.totalorder %s4759_s22, 1  ;;  %p6871_p10 = scmp.lt.s32.totalorder %s7007_s20, 2 }
   0xf   : > { %p7123_p11 = por %p281_p7, %p41_p0  ;;  %s337_s30 = sand.u32 1, %s7003_s19  }
  0x10   : > { %p7127_p12 = por %p287_p8, %p47_p3  ;;  %s6857_s12 = smul.u32 1536, %s7007_s20 }
  0x11   : > { %s8308_s28 = scalar_select %p7123_p11, 1, 0 }
  0x12   : > { %s8309_s29 = scalar_select %p7127_p12, 1, 0 }
  0x13   : > { %s6856_s13 = smul.u32 96, %s337_s30  ;;  %s7136_s16 = scalar_lea.hbm %s8287_s0, %s6857_s12 }
  0x14   : > { %8310 = sst [smem:[#allocation13_spill]] %s8309_s29  ;;  %p7138_p13 = pnand %p6871_p10, %p43_p5 }
  0x15   : > { %s341_s24 = scalar_lea.vmem [#allocation4], %s6856_s13  ;;  %s7144_s26 = scalar_lea.sflag [#allocation5], %s337_s30 }
  0x16   : > { %s348_s25 = sshll.u32 %s341_s24, 4  ;;  %s6911_s19 = scalar_lea.hbm %s7136_s16, 1536  ;;  %s7142_s25 = int_to_ptr.vmem [resolvable:$true] %s348_s25 }
  0x17   : > { %p6912_p0 = scmp.ne.s32.totalorder %s7136_s16, %s6911_s19  ;;  %p6913_p1 = pneg %p7138_p13 }
  0x18   : > { %s6916_s15 = scalar_lea.hbm %s8287_s0, 3072  ;;  %p6917_p4 = scmp.lt.u32.totalorder %s7136_s16, %s8287_s0 }
  0x19   : > { %p6914_p2 = pnand %p6913_p1, %p6912_p0  ;;  %p6918_p5 = scmp.lt.u32.totalorder %s6916_s15, %s6911_s19 }
  0x1a   : > { %p6920_p8 = scmp.lt.u32.totalorder %s6911_s19, %s7136_s16 }
  0x1b   : > { %p6915_p3 = pneg %p6914_p2  ;;  %p6919_p7 = por %p6918_p5, %p6917_p4 }
  0x1d   : > { %p6921_p10 = por %p6920_p8, %p6919_p7 }
  0x1f   : > { %p6922_p9 = pnand %p6921_p10, %p6915_p3 }
  0x21   : > { %6925 = shalt.err (!%p6922_p9)
}
  0x22   : > { %s6926_s30 = scalar_lea.vmem %s7142_s25, 1536  ;;  %s7009_s13 = smov [#allocation4]  }
  0x23   : > { %p6927_p0 = scmp.ne.s32.totalorder %s7142_s25, %s6926_s30  ;;  %s6931_s24 = sshll.u32 %s7009_s13, 4  ;;  %s6932_s24 = int_to_ptr.vmem [resolvable:$false] %s6931_s24 }
  0x24   : > { %s6933_s23 = scalar_lea.vmem %s6932_s24, 3072  ;;  %p6934_p11 = scmp.lt.s32.totalorder %s7142_s25, %s6932_s24 }
  0x25   : > { %p6929_p2 = pnand %p6927_p0, %p6913_p1  ;;  %p6935_p4 = scmp.lt.s32.totalorder %s6933_s23, %s6926_s30 }
  0x27   : > { %p6930_p12 = pneg %p6929_p2  ;;  %p6936_p5 = por %p6935_p4, %p6934_p11 }
  0x29   : > { %p6937_p7 = pnand %p6936_p5, %p6930_p12 }
  0x2b   : > { %6940 = shalt.err (!%p6937_p7)
}
  0x2c   : > { %s7010_s19 = smov 128   ;;  %s7011_s29 = smov 8  }
  0x2d   : > { %6866 = dma.hbm_to_vmem [thread:$0]  (!%p7138_p13), %s7136_s16, 1536, %s7142_s25, %s7144_s26, %s7010_s19, %s7010_s19, %s7011_s29  }
  0x2e   : > { %p4763_p9 = scmp.ge.s32.totalorder %s7007_s20, 1  ;;  %p356_p1 = scmp.lt.s32.totalorder %s7007_s20, 3 }
  0x30   : > { %p357_p3 = pnand %p4763_p9, %p356_p1 }
  0x31   : > { %s7175_s12 = sand.u32 (!%p357_p3), 1, %s6999_s18  }
  0x32   : > { %360 = sbr.rel (%p357_p3) target bundleno = 1662 (0x67e), region = 64  ;;  %s363_s15 = scalar_lea.sflag (!%p357_p3), [#allocation5], %s7175_s12 }
  0x33   : > { %s6858_s14 = smul.u32 (!%p357_p3), 96, %s7175_s12 }
  0x35   : > { %s7179_s30 = scalar_lea.vmem (!%p357_p3), [#allocation4], %s6858_s14 }
  0x39   : > { %6986 = dma.done.wait (%p7116_p6), %s363_s15, 1536  }
  0x3a   : > { %6988 = vsyncadd (%p7116_p6), %s363_s15, 4294965760  ;;  %v4768_v0 = vld [vmem:[%s8288_s1 + $0x20] sm:$0xff]  ;;  %v4769_v1 = vld [vmem:[%s8288_s1 + $0x28] sm:$0xff]  ;;  %vm426_vm0 = vcmask 261120   ;;  %vm2877_vm2 = vcmask 236544   ;;  %vm2884_vm6 = vcmask 1044480  }
  0x3b   : > { %v4780_v2 = vld [vmem:[%s8289_s2 + $0x20] sm:$0xff]  ;;  %v6258_v3 = vpack.c.bf16 %v4769_v1, %v4768_v0  ;;  %v4781_v4 = vld [vmem:[%s8289_s2 + $0x28] sm:$0xff]  ;;  %v4770_v5 = vld [vmem:[%s8288_s1 + $0x30] sm:$0xff]  ;;  %vm7013_vm7 = vmmov 1   ;;  %vm3094_vm9 = vcmask 1043456   ;;  %vm3048_vm10 = vcmask 685056  }
  0x3c   : > { %v4771_v6 = vld [vmem:[%s8288_s1 + $0x38] sm:$0xff]  ;;  %v6274_v7 = vpack.c.bf16 %v4781_v4, %v4780_v2  ;;  %v4782_v9 = vld [vmem:[%s8289_s2 + $0x30] sm:$0xff]  ;;  %v408_v13 = vld [vmem:[%s8288_s1] sm:$0xff]  ;;  %vm3046_vm11 = vcmask 687104   ;;  %vm7015_vm12 = vmmov 0   ;;  %vm4017_vm13 = vcmask 1041408  }
  0x3d   : > { %v6262_v8 = vpack.c.bf16 %v4771_v6, %v4770_v5  ;;  %v4783_v10 = vld [vmem:[%s8289_s2 + $0x38] sm:$0xff]  ;;  %6259 = vmatprep.subr.bf16.mxu0 %v6258_v3  ;;  %v409_v14 = vld [vmem:[%s8288_s1 + $0x8] sm:$0xff]  ;;  %v412_v15 = vld [vmem:[%s8289_s2] sm:$0xff]  ;;  %vm4014_vm15 = vcmask 80896   ;;  %s5149_s27 = sshll.u32 %s7098_s21, 4  ;;  %s403_s29 = scalar_lea.vmem [#allocation7], %s7175_s12 }
  0x3e   : > { %v4764_v11 = vld [vmem:[%s7179_s30 + $0x20] sm:$0xff]  ;;  %v6278_v12 = vpack.c.bf16 %v4783_v10, %v4782_v9  ;;  %6275 = vmatprep.subr.bf16.mxu1 %v6274_v7  ;;  %6261 = vmatpush3.bf16.msra.mxu0 %v6258_v3  ;;  %v413_v16 = vld [vmem:[%s8289_s2 + $0x8] sm:$0xff]  ;;  %v6266_v17 = vpack.c.bf16 %v409_v14, %v408_v13  ;;  %v410_v19 = vld [vmem:[%s8288_s1 + $0x10] sm:$0xff]  ;;  %s4693_s14 = sshll.u32 %s403_s29, 4  ;;  %s8243_s26 = scalar_lea.hbm %s8298_s11, %s5149_s27  ;;  %s8245_s14 = int_to_ptr.vmem [resolvable:$true] %s4693_s14 }
  0x3f   : > { %5546 = vmatprep.mubr.msk.f32.mxu0 %vm426_vm0, %v4764_v11  ;;  %6277 = vmatpush3.bf16.msra.mxu1 %v6274_v7  ;;  %v6282_v18 = vpack.c.bf16 %v413_v16, %v412_v15  ;;  %v411_v20 = vld [vmem:[%s8288_s1 + $0x18] sm:$0xff]  ;;  %v4765_v21 = vld [vmem:[%s7179_s30 + $0x28] sm:$0xff]  ;;  %v414_v22 = vld [vmem:[%s8289_s2 + $0x10] sm:$0xff]  ;;  %s4681_s16 = scalar_lea.sflag [#allocation6], %s7175_s12  ;;  %s6941_s22 = scalar_lea.vmem %s8245_s14, 16 }
  0x40   : > { %6263 = vmatprep.subr.bf16.mxu0 %v6262_v8  ;;  %6279 = vmatprep.subr.bf16.mxu1 %v6278_v12  ;;  %v415_v23 = vld [vmem:[%s8289_s2 + $0x18] sm:$0xff]  ;;  %v4766_v24 = vld [vmem:[%s7179_s30 + $0x30] sm:$0xff]  ;;  %v6270_v25 = vpack.c.bf16 %v411_v20, %v410_v19  ;;  %v4796_v27 = vld [vmem:[%s8288_s1 + $0x40] sm:$0xff]  ;;  %p6942_p6 = scmp.ne.s32.totalorder %s8245_s14, %s6941_s22  ;;  %p8316_p11 = scmp.ne.s32.totalorder %s8308_s28, 0 }
  0x41   : > { %5574 = vmatprep.mubr.msk.f32.mxu1 %vm426_vm0, %v4764_v11  ;;  %v6286_v26 = vpack.c.bf16 %v415_v23, %v414_v22  ;;  %v4797_v28 = vld [vmem:[%s8288_s1 + $0x48] sm:$0xff]  ;;  %v4767_v29 = vld [vmem:[%s7179_s30 + $0x38] sm:$0x1f]  ;;  %v4804_v30 = vld [vmem:[%s8289_s2 + $0x40] sm:$0xff]  ;;  %s7016_s21 = smov [#allocation7]  }
  0x42   : > { %6265 = vmatpush3.bf16.msra.mxu0 %v6262_v8  ;;  %v4805_v31 = vld [vmem:[%s8289_s2 + $0x48] sm:$0xff]  ;;  %v404_v32 = vld [vmem:[%s7179_s30] sm:$0xff]  ;;  %v6290_v33 = vpack.c.bf16 %v4797_v28, %v4796_v27  ;;  %v4798_v35 = vld [vmem:[%s8288_s1 + $0x50] sm:$0xff]  ;;  %p6943_p12 = pnand %p6942_p6, %p8316_p11  ;;  %s6945_s25 = sshll.u32 %s7016_s21, 4  ;;  %s6946_s25 = int_to_ptr.vmem [resolvable:$false] %s6945_s25 }
  0x43   : > { %6281 = vmatpush3.bf16.msra.mxu1 %v6278_v12  ;;  %6267 = vmatprep.subr.bf16.mxu0 %v6266_v17  ;;  %v6298_v34 = vpack.c.bf16 %v4805_v31, %v4804_v30  ;;  %v4799_v36 = vld [vmem:[%s8288_s1 + $0x58] sm:$0xff]  ;;  %v405_v37 = vld [vmem:[%s7179_s30 + $0x8] sm:$0xff]  ;;  %v4806_v38 = vld [vmem:[%s8289_s2 + $0x50] sm:$0xff]  ;;  %s6947_s13 = scalar_lea.vmem %s6946_s25, 32  ;;  %p6948_p8 = scmp.lt.s32.totalorder %s8245_s14, %s6946_s25 }
  0x44   : > { %6283 = vmatprep.subr.bf16.mxu1 %v6282_v18  ;;  %v4807_v39 = vld [vmem:[%s8289_s2 + $0x58] sm:$0xff]  ;;  %v406_v40 = vld [vmem:[%s7179_s30 + $0x10] sm:$0xff]  ;;  %v6294_v41 = vpack.c.bf16 %v4799_v36, %v4798_v35  ;;  %v4812_v43 = vld [vmem:[%s8288_s1 + $0x60] sm:$0xff]  ;;  %p6944_p13 = pneg %p6943_p12  ;;  %p6949_p10 = scmp.lt.s32.totalorder %s6947_s13, %s6941_s22 }
  0x45   : > { %5547 = vmatmul.mubr.msk.f32.vlgmr.msra.gmra.mrb[0].mxu0 %vm426_vm0, %v4765_v21  ;;  %v6302_v42 = vpack.c.bf16 %v4807_v39, %v4806_v38  ;;  %v4813_v44 = vld [vmem:[%s8288_s1 + $0x68] sm:$0xff]  ;;  %v407_v45 = vld [vmem:[%s7179_s30 + $0x18] sm:$0x1f]  ;;  %v4820_v46 = vld [vmem:[%s8289_s2 + $0x60] sm:$0xff] }
  0x46   : > { %5575 = vmatmul.mubr.msk.f32.vlgmr.msra.gmra.mrb[0].mxu1 %vm426_vm0, %v4765_v21  ;;  %6269 = vmatpush3.bf16.msra.mxu0 %v6266_v17  ;;  %v4821_v47 = vld [vmem:[%s8289_s2 + $0x68] sm:$0xff]  ;;  %v4792_v48 = vld [vmem:[%s7179_s30 + $0x40] sm:$0xff]  ;;  %v6306_v49 = vpack.c.bf16 %v4813_v44, %v4812_v43  ;;  %v4814_v51 = vld [vmem:[%s8288_s1 + $0x70] sm:$0xff]  ;;  %p6950_p0 = por %p6949_p10, %p6948_p8 }
  0x47   : > { %6285 = vmatpush3.bf16.msra.mxu1 %v6282_v18  ;;  %5549 = vmatprep.mubr.msk.f32.mxu0 %vm426_vm0, %v4766_v24  ;;  %v6314_v50 = vpack.c.bf16 %v4821_v47, %v4820_v46  ;;  %v4815_v52 = vld [vmem:[%s8288_s1 + $0x78] sm:$0xff]  ;;  %v4793_v53 = vld [vmem:[%s7179_s30 + $0x48] sm:$0xff]  ;;  %v4822_v54 = vld [vmem:[%s8289_s2 + $0x70] sm:$0xff] }
  0x48   : > { %5577 = vmatprep.mubr.msk.f32.mxu1 %vm426_vm0, %v4766_v24  ;;  %6271 = vmatprep.subr.bf16.mxu0 %v6270_v25  ;;  %v4823_v55 = vld [vmem:[%s8289_s2 + $0x78] sm:$0xff]  ;;  %v4794_v56 = vld [vmem:[%s7179_s30 + $0x50] sm:$0xff]  ;;  %v6310_v57 = vpack.c.bf16 %v4815_v52, %v4814_v51  ;;  %v4832_v59 = vld [vmem:[%s8288_s1 + $0x80] sm:$0xff]  ;;  %p6951_p2 = pnand %p6950_p0, %p6944_p13 }
  0x49   : > { %5550 = vmatmul.mubr.msk.f32.gmra.mrb[2].mxu0 %vm426_vm0, %v4767_v29  ;;  %6287 = vmatprep.subr.bf16.mxu1 %v6286_v26  ;;  %v6318_v58 = vpack.c.bf16 %v4823_v55, %v4822_v54  ;;  %v4833_v60 = vld [vmem:[%s8288_s1 + $0x88] sm:$0xff]  ;;  %v4795_v61 = vld [vmem:[%s7179_s30 + $0x58] sm:$0x1f]  ;;  %v4840_v62 = vld [vmem:[%s8289_s2 + $0x80] sm:$0xff] }
  0x4a   : > { %5578 = vmatmul.mubr.msk.f32.gmra.mrb[2].mxu1 %vm426_vm0, %v4767_v29  ;;  %6273 = vmatpush3.bf16.msra.mxu0 %v6270_v25  ;;  %v4841_v63 = vld [vmem:[%s8289_s2 + $0x88] sm:$0xff]  ;;  %v1001_v0 = vld [vmem:[%s7179_s30 + $0x1] sm:$0xff]  ;;  %v6322_v1 = vpack.c.bf16 %v4833_v60, %v4832_v59  ;;  %v4834_v3 = vld [vmem:[%s8288_s1 + $0x90] sm:$0xff] }
  0x4b   : > { %6289 = vmatpush3.bf16.msra.mxu1 %v6286_v26  ;;  %5560 = vmatprep.mubr.msk.f32.mxu0 %vm426_vm0, %v404_v32  ;;  %v6330_v2 = vpack.c.bf16 %v4841_v63, %v4840_v62  ;;  %v4835_v4 = vld [vmem:[%s8288_s1 + $0x98] sm:$0xff]  ;;  %v1002_v5 = vld [vmem:[%s7179_s30 + $0x9] sm:$0xff]  ;;  %v4842_v6 = vld [vmem:[%s8289_s2 + $0x90] sm:$0xff] }
  0x4c   : > { %5588 = vmatprep.mubr.msk.f32.mxu1 %vm426_vm0, %v404_v32  ;;  %6291 = vmatprep.subr.bf16.mxu0 %v6290_v33  ;;  %v4843_v7 = vld [vmem:[%s8289_s2 + $0x98] sm:$0xff]  ;;  %v1003_v8 = vld [vmem:[%s7179_s30 + $0x11] sm:$0xff]  ;;  %v6326_v9 = vpack.c.bf16 %v4835_v4, %v4834_v3  ;;  %v4852_v11 = vld [vmem:[%s8288_s1 + $0xa0] sm:$0xff] }
  0x4d   : > { %5561 = vmatmul.mubr.msk.f32.vlgmr.msra.gmra.mrb[0].mxu0 %vm426_vm0, %v405_v37  ;;  %6299 = vmatprep.subr.bf16.mxu1 %v6298_v34  ;;  %v6334_v10 = vpack.c.bf16 %v4843_v7, %v4842_v6  ;;  %v4853_v12 = vld [vmem:[%s8288_s1 + $0xa8] sm:$0xff]  ;;  %v1004_v13 = vld [vmem:[%s7179_s30 + $0x19] sm:$0x1f]  ;;  %v4860_v14 = vld [vmem:[%s8289_s2 + $0xa0] sm:$0xff] }
  0x4e   : > { %5589 = vmatmul.mubr.msk.f32.vlgmr.msra.gmra.mrb[0].mxu1 %vm426_vm0, %v405_v37  ;;  %6293 = vmatpush3.bf16.msra.mxu0 %v6290_v33  ;;  %v4861_v15 = vld [vmem:[%s8289_s2 + $0xa8] sm:$0xff]  ;;  %v4828_v16 = vld [vmem:[%s7179_s30 + $0x21] sm:$0xff]  ;;  %v6338_v17 = vpack.c.bf16 %v4853_v12, %v4852_v11  ;;  %v4854_v19 = vld [vmem:[%s8288_s1 + $0xb0] sm:$0xff] }
  0x4f   : > { %6301 = vmatpush3.bf16.msra.mxu1 %v6298_v34  ;;  %5563 = vmatprep.mubr.msk.f32.mxu0 %vm426_vm0, %v406_v40  ;;  %v6346_v18 = vpack.c.bf16 %v4861_v15, %v4860_v14  ;;  %v4855_v20 = vld [vmem:[%s8288_s1 + $0xb8] sm:$0xff]  ;;  %v4829_v21 = vld [vmem:[%s7179_s30 + $0x29] sm:$0xff]  ;;  %v4862_v22 = vld [vmem:[%s8289_s2 + $0xb0] sm:$0xff] }
  0x50   : > { %5591 = vmatprep.mubr.msk.f32.mxu1 %vm426_vm0, %v406_v40  ;;  %6295 = vmatprep.subr.bf16.mxu0 %v6294_v41  ;;  %v4863_v23 = vld [vmem:[%s8289_s2 + $0xb8] sm:$0xff]  ;;  %v4830_v24 = vld [vmem:[%s7179_s30 + $0x31] sm:$0xff]  ;;  %v6342_v25 = vpack.c.bf16 %v4855_v20, %v4854_v19  ;;  %v4868_v27 = vld [vmem:[%s8288_s1 + $0xc0] sm:$0xff] }
  0x51   : > { %5564 = vmatmul.mubr.msk.f32.gmra.mrb[2].mxu0 %vm426_vm0, %v407_v45  ;;  %6303 = vmatprep.subr.bf16.mxu1 %v6302_v42  ;;  %v6350_v26 = vpack.c.bf16 %v4863_v23, %v4862_v22  ;;  %v4869_v28 = vld [vmem:[%s8288_s1 + $0xc8] sm:$0xff]  ;;  %v4831_v29 = vld [vmem:[%s7179_s30 + $0x39] sm:$0x1f]  ;;  %v4876_v30 = vld [vmem:[%s8289_s2 + $0xc0] sm:$0xff] }
  0x52   : > { %5592 = vmatmul.mubr.msk.f32.gmra.mrb[2].mxu1 %vm426_vm0, %v407_v45  ;;  %6297 = vmatpush3.bf16.msra.mxu0 %v6294_v41  ;;  %v4877_v31 = vld [vmem:[%s8289_s2 + $0xc8] sm:$0xff]  ;;  %v4848_v32 = vld [vmem:[%s7179_s30 + $0x41] sm:$0xff]  ;;  %v6354_v33 = vpack.c.bf16 %v4869_v28, %v4868_v27  ;;  %v4870_v35 = vld [vmem:[%s8288_s1 + $0xd0] sm:$0xff] }
  0x53   : > { %6305 = vmatpush3.bf16.msra.mxu1 %v6302_v42  ;;  %5602 = vmatprep.mubr.msk.f32.mxu0 %vm426_vm0, %v4792_v48  ;;  %v6362_v34 = vpack.c.bf16 %v4877_v31, %v4876_v30  ;;  %v4871_v36 = vld [vmem:[%s8288_s1 + $0xd8] sm:$0xff]  ;;  %v4849_v37 = vld [vmem:[%s7179_s30 + $0x49] sm:$0xff]  ;;  %v4878_v38 = vld [vmem:[%s8289_s2 + $0xd0] sm:$0xff] }
  0x54   : > { %5616 = vmatprep.mubr.msk.f32.mxu1 %vm426_vm0, %v4792_v48  ;;  %6307 = vmatprep.subr.bf16.mxu0 %v6306_v49  ;;  %v4879_v39 = vld [vmem:[%s8289_s2 + $0xd8] sm:$0xff]  ;;  %v4850_v40 = vld [vmem:[%s7179_s30 + $0x51] sm:$0xff]  ;;  %v6358_v41 = vpack.c.bf16 %v4871_v36, %v4870_v35  ;;  %v4888_v43 = vld [vmem:[%s8288_s1 + $0xe0] sm:$0xff] }
  0x55   : > { %5603 = vmatmul.mubr.msk.f32.vlgmr.msra.gmra.mrb[0].mxu0 %vm426_vm0, %v4793_v53  ;;  %6315 = vmatprep.subr.bf16.mxu1 %v6314_v50  ;;  %v6366_v42 = vpack.c.bf16 %v4879_v39, %v4878_v38  ;;  %v4889_v44 = vld [vmem:[%s8288_s1 + $0xe8] sm:$0xff]  ;;  %v4851_v45 = vld [vmem:[%s7179_s30 + $0x59] sm:$0x1f]  ;;  %v4896_v46 = vld [vmem:[%s8289_s2 + $0xe0] sm:$0xff] }
  0x56   : > { %5617 = vmatmul.mubr.msk.f32.vlgmr.msra.gmra.mrb[0].mxu1 %vm426_vm0, %v4793_v53  ;;  %6309 = vmatpush3.bf16.msra.mxu0 %v6306_v49  ;;  %v4897_v47 = vld [vmem:[%s8289_s2 + $0xe8] sm:$0xff]  ;;  %v1613_v48 = vld [vmem:[%s7179_s30 + $0x2] sm:$0xff]  ;;  %v6370_v49 = vpack.c.bf16 %v4889_v44, %v4888_v43  ;;  %v4890_v51 = vld [vmem:[%s8288_s1 + $0xf0] sm:$0xff] }
  0x57   : > { %6317 = vmatpush3.bf16.msra.mxu1 %v6314_v50  ;;  %5605 = vmatprep.mubr.msk.f32.mxu0 %vm426_vm0, %v4794_v56  ;;  %v6378_v50 = vpack.c.bf16 %v4897_v47, %v4896_v46  ;;  %v4891_v52 = vld [vmem:[%s8288_s1 + $0xf8] sm:$0xff]  ;;  %v1614_v53 = vld [vmem:[%s7179_s30 + $0xa] sm:$0xff]  ;;  %v4898_v54 = vld [vmem:[%s8289_s2 + $0xf0] sm:$0xff] }
  0x58   : > { %5619 = vmatprep.mubr.msk.f32.mxu1 %vm426_vm0, %v4794_v56  ;;  %6311 = vmatprep.subr.bf16.mxu0 %v6310_v57  ;;  %v4899_v55 = vld [vmem:[%s8289_s2 + $0xf8] sm:$0xff]  ;;  %v1615_v56 = vld [vmem:[%s7179_s30 + $0x12] sm:$0xff]  ;;  %v4908_v59 = vld [vmem:[%s8288_s1 + $0x100] sm:$0xff] }
  0x59   : > { %5606 = vmatmul.mubr.msk.f32.gmra.mrb[2].mxu0 %vm426_vm0, %v4795_v61  ;;  %6319 = vmatprep.subr.bf16.mxu1 %v6318_v58  ;;  %v4909_v60 = vld [vmem:[%s8288_s1 + $0x108] sm:$0xff]  ;;  %v4916_v62 = vld [vmem:[%s8289_s2 + $0x100] sm:$0xff]  ;;  %v4910_v3 = vld [vmem:[%s8288_s1 + $0x110] sm:$0xff] }
  0x5a   : > { %5620 = vmatmul.mubr.msk.f32.gmra.mrb[2].mxu1 %vm426_vm0, %v4795_v61  ;;  %6313 = vmatpush3.bf16.msra.mxu0 %v6310_v57  ;;  %v6374_v57 = vpack.c.bf16 %v4891_v52, %v4890_v51  ;;  %v1616_v61 = vld [vmem:[%s7179_s30 + $0x1a] sm:$0x1f]  ;;  %v4917_v63 = vld [vmem:[%s8289_s2 + $0x108] sm:$0xff]  ;;  %v4911_v4 = vld [vmem:[%s8288_s1 + $0x118] sm:$0xff] }
  0x5b   : > { %6321 = vmatpush3.bf16.msra.mxu1 %v6318_v58  ;;  %5630 = vmatprep.mubr.msk.f32.mxu0 %vm426_vm0, %v1001_v0  ;;  %v6382_v58 = vpack.c.bf16 %v4899_v55, %v4898_v54  ;;  %v4918_v6 = vld [vmem:[%s8289_s2 + $0x110] sm:$0xff]  ;;  %v4919_v7 = vld [vmem:[%s8289_s2 + $0x118] sm:$0xff]  ;;  %v4924_v11 = vld [vmem:[%s8288_s1 + $0x120] sm:$0xff] }
  0x5c   : > { %5644 = vmatprep.mubr.msk.f32.mxu1 %vm426_vm0, %v1001_v0  ;;  %6323 = vmatprep.subr.bf16.mxu0 %v6322_v1  ;;  %v4884_v0 = vld [vmem:[%s7179_s30 + $0x22] sm:$0xff]  ;;  %v4925_v12 = vld [vmem:[%s8288_s1 + $0x128] sm:$0xff]  ;;  %v4926_v19 = vld [vmem:[%s8288_s1 + $0x130] sm:$0xff] }
  0x5d   : > { %5631 = vmatmul.mubr.msk.f32.vlgmr.msra.gmra.mrb[0].mxu0 %vm426_vm0, %v1002_v5  ;;  %6331 = vmatprep.subr.bf16.mxu1 %v6330_v2  ;;  %v4932_v14 = vld [vmem:[%s8289_s2 + $0x120] sm:$0xff]  ;;  %v4933_v15 = vld [vmem:[%s8289_s2 + $0x128] sm:$0xff]  ;;  %v4927_v20 = vld [vmem:[%s8288_s1 + $0x138] sm:$0xff] }
  0x5e   : > { %5645 = vmatmul.mubr.msk.f32.vlgmr.msra.gmra.mrb[0].mxu1 %vm426_vm0, %v1002_v5  ;;  %6325 = vmatpush3.bf16.msra.mxu0 %v6322_v1  ;;  %v6386_v1 = vpack.c.bf16 %v4909_v60, %v4908_v59  ;;  %v4885_v5 = vld [vmem:[%s7179_s30 + $0x2a] sm:$0xff]  ;;  %v4934_v22 = vld [vmem:[%s8289_s2 + $0x130] sm:$0xff]  ;;  %v4935_v23 = vld [vmem:[%s8289_s2 + $0x138] sm:$0xff] }
  0x5f   : > { %6333 = vmatpush3.bf16.msra.mxu1 %v6330_v2  ;;  %5633 = vmatprep.mubr.msk.f32.mxu0 %vm426_vm0, %v1003_v8  ;;  %v6394_v2 = vpack.c.bf16 %v4917_v63, %v4916_v62  ;;  %v4944_v27 = vld [vmem:[%s8288_s1 + $0x140] sm:$0xff]  ;;  %v4945_v28 = vld [vmem:[%s8288_s1 + $0x148] sm:$0xff]  ;;  %v4946_v35 = vld [vmem:[%s8288_s1 + $0x150] sm:$0xff] }
  0x60   : > { %5647 = vmatprep.mubr.msk.f32.mxu1 %vm426_vm0, %v1003_v8  ;;  %6327 = vmatprep.subr.bf16.mxu0 %v6326_v9  ;;  %v4886_v8 = vld [vmem:[%s7179_s30 + $0x32] sm:$0xff]  ;;  %v4952_v30 = vld [vmem:[%s8289_s2 + $0x140] sm:$0xff]  ;;  %v4947_v36 = vld [vmem:[%s8288_s1 + $0x158] sm:$0xff] }
  0x61   : > { %5634 = vmatmul.mubr.msk.f32.gmra.mrb[2].mxu0 %vm426_vm0, %v1004_v13  ;;  %6335 = vmatprep.subr.bf16.mxu1 %v6334_v10  ;;  %v4953_v31 = vld [vmem:[%s8289_s2 + $0x148] sm:$0xff]  ;;  %v4954_v38 = vld [vmem:[%s8289_s2 + $0x150] sm:$0xff]  ;;  %v4955_v39 = vld [vmem:[%s8289_s2 + $0x158] sm:$0xff] }
  0x62   : > { %5648 = vmatmul.mubr.msk.f32.gmra.mrb[2].mxu1 %vm426_vm0, %v1004_v13  ;;  %6329 = vmatpush3.bf16.msra.mxu0 %v6326_v9  ;;  %v6390_v9 = vpack.c.bf16 %v4911_v4, %v4910_v3  ;;  %v4887_v13 = vld [vmem:[%s7179_s30 + $0x3a] sm:$0x1f]  ;;  %v4964_v43 = vld [vmem:[%s8288_s1 + $0x160] sm:$0xff]  ;;  %v4965_v44 = vld [vmem:[%s8288_s1 + $0x168] sm:$0xff] }
  0x63   : > { %6337 = vmatpush3.bf16.msra.mxu1 %v6334_v10  ;;  %5658 = vmatprep.mubr.msk.f32.mxu0 %vm426_vm0, %v4828_v16  ;;  %v6398_v10 = vpack.c.bf16 %v4919_v7, %v4918_v6  ;;  %v4972_v46 = vld [vmem:[%s8289_s2 + $0x160] sm:$0xff]  ;;  %v4973_v47 = vld [vmem:[%s8289_s2 + $0x168] sm:$0xff]  ;;  %v4966_v51 = vld [vmem:[%s8288_s1 + $0x170] sm:$0xff] }
  0x64   : > { %5672 = vmatprep.mubr.msk.f32.mxu1 %vm426_vm0, %v4828_v16  ;;  %6339 = vmatprep.subr.bf16.mxu0 %v6338_v17  ;;  %v4904_v16 = vld [vmem:[%s7179_s30 + $0x42] sm:$0xff]  ;;  %v4974_v54 = vld [vmem:[%s8289_s2 + $0x170] sm:$0xff]  ;;  %vm7647_vm8 = vmpackc.low %vm2884_vm6, %vm7013_vm7 }
  0x65   : > { %5659 = vmatmul.mubr.msk.f32.vlgmr.msra.gmra.mrb[0].mxu0 %vm426_vm0, %v4829_v21  ;;  %6347 = vmatprep.subr.bf16.mxu1 %v6346_v18  ;;  %v4967_v52 = vld [vmem:[%s8288_s1 + $0x178] sm:$0xff]  ;;  %v4943_v59 = vld [vmem:[%s7179_s30 + $0x3b] sm:$0x1f]  ;;  %v4962_v62 = vld [vmem:[%s7179_s30 + $0x53] sm:$0xff] }
  0x66   : > { %5673 = vmatmul.mubr.msk.f32.vlgmr.msra.gmra.mrb[0].mxu1 %vm426_vm0, %v4829_v21  ;;  %6341 = vmatpush3.bf16.msra.mxu0 %v6338_v17  ;;  %v6402_v17 = vpack.c.bf16 %v4925_v12, %v4924_v11  ;;  %v4905_v21 = vld [vmem:[%s7179_s30 + $0x4a] sm:$0xff]  ;;  %v4975_v55 = vld [vmem:[%s8289_s2 + $0x178] sm:$0xff]  ;;  %v4963_v63 = vld [vmem:[%s7179_s30 + $0x5b] sm:$0x1f] }
  0x67   : > { %6349 = vmatpush3.bf16.msra.mxu1 %v6346_v18  ;;  %5661 = vmatprep.mubr.msk.f32.mxu0 %vm426_vm0, %v4830_v24  ;;  %v6410_v18 = vpack.c.bf16 %v4933_v15, %v4932_v14  ;;  %v4960_v60 = vld [vmem:[%s7179_s30 + $0x43] sm:$0xff]  ;;  %v5025_v11 = vld [vmem:[%s8291_s4 + $0xb0] sm:$0xff]  ;;  %vm6672_vm14 = vmpackc.low %vm4017_vm13, %vm7013_vm7 }
  0x68   : > { %5675 = vmatprep.mubr.msk.f32.mxu1 %vm426_vm0, %v4830_v24  ;;  %6343 = vmatprep.subr.bf16.mxu0 %v6342_v25  ;;  %v4906_v24 = vld [vmem:[%s7179_s30 + $0x52] sm:$0xff]  ;;  %v4980_v14 = vld [vmem:[%s8290_s3] ss:$0 sm:$0xff] }
  0x69   : > { %5662 = vmatmul.mubr.msk.f32.gmra.mrb[2].mxu0 %vm426_vm0, %v4831_v29  ;;  %6351 = vmatprep.subr.bf16.mxu1 %v6350_v26 }
  0x6a   : > { %5676 = vmatmul.mubr.msk.f32.gmra.mrb[2].mxu1 %vm426_vm0, %v4831_v29  ;;  %6345 = vmatpush3.bf16.msra.mxu0 %v6342_v25  ;;  %v6406_v25 = vpack.c.bf16 %v4927_v20, %v4926_v19  ;;  %v4907_v29 = vld [vmem:[%s7179_s30 + $0x5a] sm:$0x1f] }
  0x6b   : > { %6353 = vmatpush3.bf16.msra.mxu1 %v6350_v26  ;;  %5686 = vmatprep.mubr.msk.f32.mxu0 %vm426_vm0, %v4848_v32  ;;  %v6414_v26 = vpack.c.bf16 %v4935_v23, %v4934_v22 }
  0x6c   : > { %5700 = vmatprep.mubr.msk.f32.mxu1 %vm426_vm0, %v4848_v32  ;;  %6355 = vmatprep.subr.bf16.mxu0 %v6354_v33  ;;  %v2225_v32 = vld [vmem:[%s7179_s30 + $0x3] sm:$0xff] }
  0x6d   : > { %5687 = vmatmul.mubr.msk.f32.vlgmr.msra.gmra.mrb[0].mxu0 %vm426_vm0, %v4849_v37  ;;  %6363 = vmatprep.subr.bf16.mxu1 %v6362_v34 }
  0x6e   : > { %5701 = vmatmul.mubr.msk.f32.vlgmr.msra.gmra.mrb[0].mxu1 %vm426_vm0, %v4849_v37  ;;  %6357 = vmatpush3.bf16.msra.mxu0 %v6354_v33  ;;  %v6418_v33 = vpack.c.bf16 %v4945_v28, %v4944_v27  ;;  %v2226_v37 = vld [vmem:[%s7179_s30 + $0xb] sm:$0xff] }
  0x6f   : > { %6365 = vmatpush3.bf16.msra.mxu1 %v6362_v34  ;;  %5689 = vmatprep.mubr.msk.f32.mxu0 %vm426_vm0, %v4850_v40  ;;  %v6426_v34 = vpack.c.bf16 %v4953_v31, %v4952_v30 }
  0x70   : > { %5703 = vmatprep.mubr.msk.f32.mxu1 %vm426_vm0, %v4850_v40  ;;  %6359 = vmatprep.subr.bf16.mxu0 %v6358_v41  ;;  %v2227_v40 = vld [vmem:[%s7179_s30 + $0x13] sm:$0xff] }
  0x71   : > { %5690 = vmatmul.mubr.msk.f32.gmra.mrb[2].mxu0 %vm426_vm0, %v4851_v45  ;;  %6367 = vmatprep.subr.bf16.mxu1 %v6366_v42 }
  0x72   : > { %5704 = vmatmul.mubr.msk.f32.gmra.mrb[2].mxu1 %vm426_vm0, %v4851_v45  ;;  %6361 = vmatpush3.bf16.msra.mxu0 %v6358_v41  ;;  %v6422_v41 = vpack.c.bf16 %v4947_v36, %v4946_v35  ;;  %v2228_v45 = vld [vmem:[%s7179_s30 + $0x1b] sm:$0x1f]  ;;  %v3052_v35 = vld [vmem:[%s8291_s4] sm:$0xff]  ;;  %v3053_v36 = vld [vmem:[%s8291_s4 + $0x8] sm:$0xff] }
  0x73   : > { %6369 = vmatpush3.bf16.msra.mxu1 %v6366_v42  ;;  %5714 = vmatprep.mubr.msk.f32.mxu0 %vm426_vm0, %v1613_v48  ;;  %v6430_v42 = vpack.c.bf16 %v4955_v39, %v4954_v38  ;;  %v4166_v38 = vld [vmem:[%s8295_s8] sm:$0x1] }
  0x74   : > { %5728 = vmatprep.mubr.msk.f32.mxu1 %vm426_vm0, %v1613_v48  ;;  %6371 = vmatprep.subr.bf16.mxu0 %v6370_v49  ;;  %v4940_v48 = vld [vmem:[%s7179_s30 + $0x23] sm:$0xff] }
  0x75   : > { %5715 = vmatmul.mubr.msk.f32.vlgmr.msra.gmra.mrb[0].mxu0 %vm426_vm0, %v1614_v53  ;;  %6379 = vmatprep.subr.bf16.mxu1 %v6378_v50 }
  0x76   : > { %5729 = vmatmul.mubr.msk.f32.vlgmr.msra.gmra.mrb[0].mxu1 %vm426_vm0, %v1614_v53  ;;  %6373 = vmatpush3.bf16.msra.mxu0 %v6370_v49  ;;  %v6434_v49 = vpack.c.bf16 %v4965_v44, %v4964_v43  ;;  %v4941_v53 = vld [vmem:[%s7179_s30 + $0x2b] sm:$0xff]  ;;  %v4994_v43 = vld [vmem:[%s8291_s4 + $0x70] sm:$0xff] }
  0x77   : > { %6381 = vmatpush3.bf16.msra.mxu1 %v6378_v50  ;;  %5717 = vmatprep.mubr.msk.f32.mxu0 %vm426_vm0, %v1615_v56  ;;  %v6442_v50 = vpack.c.bf16 %v4973_v47, %v4972_v46  ;;  %v3054_v44 = vld [vmem:[%s8291_s4 + $0x10] sm:$0xff] }
  0x78   : > { %5731 = vmatprep.mubr.msk.f32.mxu1 %vm426_vm0, %v1615_v56  ;;  %6375 = vmatprep.subr.bf16.mxu0 %v6374_v57  ;;  %v4942_v56 = vld [vmem:[%s7179_s30 + $0x33] sm:$0xff] }
  0x79   : > { %5718 = vmatmul.mubr.msk.f32.gmra.mrb[2].mxu0 %vm426_vm0, %v1616_v61  ;;  %6383 = vmatprep.subr.bf16.mxu1 %v6382_v58 }
  0x7a   : > { %5732 = vmatmul.mubr.msk.f32.gmra.mrb[2].mxu1 %vm426_vm0, %v1616_v61  ;;  %6377 = vmatpush3.bf16.msra.mxu0 %v6374_v57  ;;  %v6438_v57 = vpack.c.bf16 %v4967_v52, %v4966_v51  ;;  %v4961_v61 = vld [vmem:[%s7179_s30 + $0x4b] sm:$0xff] }
  0x7b   : > { %6385 = vmatpush3.bf16.msra.mxu1 %v6382_v58  ;;  %5742 = vmatprep.mubr.msk.f32.mxu0 %vm426_vm0, %v4884_v0  ;;  %v6446_v58 = vpack.c.bf16 %v4975_v55, %v4974_v54  ;;  %v4996_v51 = vld [vmem:[%s8291_s4 + $0x80] sm:$0xff] }
  0x7c   : > { %5756 = vmatprep.mubr.msk.f32.mxu1 %vm426_vm0, %v4884_v0  ;;  %6387 = vmatprep.subr.bf16.mxu0 %v6386_v1  ;;  %v2856_v0 = vlaneseq  ;;  %v3056_v52 = vld [vmem:[%s8291_s4 + $0x20] sm:$0xff] }
  0x7d   : > { %5743 = vmatmul.mubr.msk.f32.vlgmr.msra.gmra.mrb[0].mxu0 %vm426_vm0, %v4885_v5  ;;  %6395 = vmatprep.subr.bf16.mxu1 %v6394_v2 }
  0x7e   : > { %5757 = vmatmul.mubr.msk.f32.vlgmr.msra.gmra.mrb[0].mxu1 %vm426_vm0, %v4885_v5  ;;  %6389 = vmatpush3.bf16.msra.mxu0 %v6386_v1  ;;  %v2857_v1 = vshrl.u32 %v2856_v0, 7  ;;  %v2860_v5 = vand.u32 127, %v2856_v0  ;;  %v3060_v0 = vld [vmem:[%s8291_s4 + $0x40] sm:$0xff] }
  0x7f   : > { %6397 = vmatpush3.bf16.msra.mxu1 %v6394_v2  ;;  %5745 = vmatprep.mubr.msk.f32.mxu0 %vm426_vm0, %v4886_v8 }
  0x80   : > { %5759 = vmatprep.mubr.msk.f32.mxu1 %vm426_vm0, %v4886_v8  ;;  %6391 = vmatprep.subr.bf16.mxu0 %v6390_v9  ;;  %v2858_v2 = vadd.s32 8, %v2857_v1  ;;  %v2861_v3 = vmul.u32 2, %v2857_v1  ;;  %v7012_v8 = vmov 0.0  }
  0x81   : > { %5746 = vmatmul.mubr.msk.f32.gmra.mrb[2].mxu0 %vm426_vm0, %v4887_v13  ;;  %6399 = vmatprep.subr.bf16.mxu1 %v6398_v10 }
  0x82   : > { %5760 = vmatmul.mubr.msk.f32.gmra.mrb[2].mxu1 %vm426_vm0, %v4887_v13  ;;  %6393 = vmatpush3.bf16.msra.mxu0 %v6390_v9  ;;  %v2862_v4 = vmul.u32 2, %v2858_v2  ;;  %v2869_v6 = vadd.s32 1, %v2861_v3  ;;  %vm2863_vm1 = vcmp.eq.s32.totalorder %v2860_v5, %v2861_v3  ;;  %v3061_v2 = vld [vmem:[%s8291_s4 + $0x48] sm:$0xff] }
  0x83   : > { %6401 = vmatpush3.bf16.msra.mxu1 %v6398_v10  ;;  %5770 = vmatprep.mubr.msk.f32.mxu0 %vm426_vm0, %v4904_v16  ;;  %v7618_v9 = vsel %vm2863_vm1, 1.0, %v7012_v8  ;;  %v6506_v3 = vpack.c.bf16 %v3061_v2, %v3060_v0  ;;  %v3067_v2 = vld [vmem:[%s8292_s5 + $0x20] sm:$0xff]  ;;  %vm4174_vm1 = vcmask 367616  }
  0x84   : > { %5784 = vmatprep.mubr.msk.f32.mxu1 %vm426_vm0, %v4904_v16  ;;  %6403 = vmatprep.subr.bf16.mxu0 %v6402_v17  ;;  %v2870_v7 = vadd.s32 1, %v2862_v4  ;;  %vm2871_vm3 = vcmp.eq.s32.totalorder %v2860_v5, %v2869_v6  ;;  %vm7623_vm4 = vcmp.eq.s32.totalorder %v2860_v5, %v2862_v4  ;;  %v5001_v4 = vld [vmem:[%s8291_s4 + $0xa8] sm:$0xf]  ;;  %v5008_v6 = vld [vmem:[%s8292_s5 + $0x58] sm:$0xff] }
  0x85   : > { %5771 = vmatmul.mubr.msk.f32.vlgmr.msra.gmra.mrb[0].mxu0 %vm426_vm0, %v4905_v21  ;;  %6411 = vmatprep.subr.bf16.mxu1 %v6410_v18  ;;  %v7621_v10 = vsel %vm2871_vm3, 1.0, %v7012_v8  ;;  %v4982_v46 = vsel %vm7623_vm4, 1.0, %v7012_v8  ;;  %vm4678_vm3 = vcmask 73728  }
  0x86   : > { %5785 = vmatmul.mubr.msk.f32.vlgmr.msra.gmra.mrb[0].mxu1 %vm426_vm0, %v4905_v21  ;;  %6405 = vmatpush3.bf16.msra.mxu0 %v6402_v17  ;;  %vm2872_vm5 = vcmp.eq.s32.totalorder %v2860_v5, %v2870_v7  ;;  %v3062_v5 = vld [vmem:[%s8291_s4 + $0x50] sm:$0xf]  ;;  %v5009_v7 = vld [vmem:[%s8292_s5 + $0x60] sm:$0xff] }
  0x87   : > { %6413 = vmatpush3.bf16.msra.mxu1 %v6410_v18  ;;  %5773 = vmatprep.mubr.msk.f32.mxu0 %vm426_vm0, %v4906_v24  ;;  %v4984_v47 = vsel %vm2872_vm5, 1.0, %v7012_v8 }
  0x88   : > { %5787 = vmatprep.mubr.msk.f32.mxu1 %vm426_vm0, %v4906_v24  ;;  %6407 = vmatprep.subr.bf16.mxu0 %v6406_v25 }
  0x89   : > { %5774 = vmatmul.mubr.msk.f32.gmra.mrb[2].mxu0 %vm426_vm0, %v4907_v29  ;;  %6415 = vmatprep.subr.bf16.mxu1 %v6414_v26 }
  0x8a   : > { %5788 = vmatmul.mubr.msk.f32.gmra.mrb[2].mxu1 %vm426_vm0, %v4907_v29  ;;  %6409 = vmatpush3.bf16.msra.mxu0 %v6406_v25 }
  0x8b   : > { %6417 = vmatpush3.bf16.msra.mxu1 %v6414_v26  ;;  %5798 = vmatprep.mubr.msk.f32.mxu0 %vm426_vm0, %v2225_v32 }
  0x8c   : > { %5812 = vmatprep.mubr.msk.f32.mxu1 %vm426_vm0, %v2225_v32  ;;  %6419 = vmatprep.subr.bf16.mxu0 %v6418_v33  ;;  %v4991_v32 = vld [vmem:[%s8291_s4 + $0x58] sm:$0xff] }
  0x8d   : > { %5799 = vmatmul.mubr.msk.f32.vlgmr.msra.gmra.mrb[0].mxu0 %vm426_vm0, %v2226_v37  ;;  %6427 = vmatprep.subr.bf16.mxu1 %v6426_v34 }
  0x8e   : > { %5813 = vmatmul.mubr.msk.f32.vlgmr.msra.gmra.mrb[0].mxu1 %vm426_vm0, %v2226_v37  ;;  %6421 = vmatpush3.bf16.msra.mxu0 %v6418_v33 }
  0x8f   : > { %6429 = vmatpush3.bf16.msra.mxu1 %v6426_v34  ;;  %5801 = vmatprep.mubr.msk.f32.mxu0 %vm426_vm0, %v2227_v40  ;;  %v4992_v34 = vld [vmem:[%s8291_s4 + $0x60] sm:$0xff] }
  0x90   : > { %5815 = vmatprep.mubr.msk.f32.mxu1 %vm426_vm0, %v2227_v40  ;;  %6423 = vmatprep.subr.bf16.mxu0 %v6422_v41  ;;  %v6470_v40 = vpack.c.bf16 %v4992_v34, %v4991_v32  ;;  %v5030_v34 = vld [vmem:[%s8291_s4 + $0xd8] sm:$0xff] }
  0x91   : > { %5802 = vmatmul.mubr.msk.f32.gmra.mrb[2].mxu0 %vm426_vm0, %v2228_v45  ;;  %6431 = vmatprep.subr.bf16.mxu1 %v6430_v42 }
  0x92   : > { %5816 = vmatmul.mubr.msk.f32.gmra.mrb[2].mxu1 %vm426_vm0, %v2228_v45  ;;  %6425 = vmatpush3.bf16.msra.mxu0 %v6422_v41  ;;  %v6490_v41 = vpack.c.bf16 %v3053_v36, %v3052_v35  ;;  %v3055_v45 = vld [vmem:[%s8291_s4 + $0x18] sm:$0xff] }
  0x93   : > { %6433 = vmatpush3.bf16.msra.mxu1 %v6430_v42  ;;  %5826 = vmatprep.mubr.msk.f32.mxu0 %vm426_vm0, %v4940_v48  ;;  %v4993_v42 = vld [vmem:[%s8291_s4 + $0x68] sm:$0xff] }
  0x94   : > { %5840 = vmatprep.mubr.msk.f32.mxu1 %vm426_vm0, %v4940_v48  ;;  %6435 = vmatprep.subr.bf16.mxu0 %v6434_v49  ;;  %v6474_v48 = vpack.c.bf16 %v4994_v43, %v4993_v42  ;;  %v5032_v42 = vld [vmem:[%s8291_s4 + $0xe8] sm:$0xff] }
  0x95   : > { %5827 = vmatmul.mubr.msk.f32.vlgmr.msra.gmra.mrb[0].mxu0 %vm426_vm0, %v4941_v53  ;;  %6443 = vmatprep.subr.bf16.mxu1 %v6442_v50 }
  0x96   : > { %5841 = vmatmul.mubr.msk.f32.vlgmr.msra.gmra.mrb[0].mxu1 %vm426_vm0, %v4941_v53  ;;  %6437 = vmatpush3.bf16.msra.mxu0 %v6434_v49  ;;  %v6494_v49 = vpack.c.bf16 %v3055_v45, %v3054_v44  ;;  %v3057_v53 = vld [vmem:[%s8291_s4 + $0x28] sm:$0xff]  ;;  %v5016_v45 = vld [vmem:[%s8292_s5 + $0x98] sm:$0xff] }
  0x97   : > { %6445 = vmatpush3.bf16.msra.mxu1 %v6442_v50  ;;  %5829 = vmatprep.mubr.msk.f32.mxu0 %vm426_vm0, %v4942_v56  ;;  %v4995_v50 = vld [vmem:[%s8291_s4 + $0x78] sm:$0xff]  ;;  %v6498_v55 = vpack.c.bf16 %v3057_v53, %v3056_v52  ;;  %v5035_v52 = vld [vmem:[%s8291_s4 + $0x100] sm:$0xf] }
  0x98   : > { %5843 = vmatprep.mubr.msk.f32.mxu1 %vm426_vm0, %v4942_v56  ;;  %6439 = vmatprep.subr.bf16.mxu0 %v6438_v57  ;;  %v6478_v54 = vpack.c.bf16 %v4996_v51, %v4995_v50  ;;  %v4997_v56 = vld [vmem:[%s8291_s4 + $0x88] sm:$0xff]  ;;  %v3063_v53 = vld [vmem:[%s8292_s5] sm:$0xff] }
  0x99   : > { %5830 = vmatmul.mubr.msk.f32.gmra.mrb[2].mxu0 %vm426_vm0, %v4943_v59  ;;  %6447 = vmatprep.subr.bf16.mxu1 %v6446_v58  ;;  %v5018_v51 = vld [vmem:[%s8292_s5 + $0xa8] sm:$0xf] }
  0x9a   : > { %5844 = vmatmul.mubr.msk.f32.gmra.mrb[2].mxu1 %vm426_vm0, %v4943_v59  ;;  %6441 = vmatpush3.bf16.msra.mxu0 %v6438_v57  ;;  %v4998_v57 = vld [vmem:[%s8291_s4 + $0x90] sm:$0xff] }
  0x9b   : > { %6449 = vmatpush3.bf16.msra.mxu1 %v6446_v58  ;;  %5854 = vmatprep.mubr.msk.f32.mxu0 %vm426_vm0, %v4960_v60  ;;  %v3058_v58 = vld [vmem:[%s8291_s4 + $0x30] sm:$0xff]  ;;  %v6482_v59 = vpack.c.bf16 %v4998_v57, %v4997_v56 }
  0x9c   : > { %5868 = vmatprep.mubr.msk.f32.mxu1 %vm426_vm0, %v4960_v60  ;;  %v3059_v60 = vld [vmem:[%s8291_s4 + $0x38] sm:$0xff]  ;;  %v5054_v56 = vld [vmem:[%s8291_s4 + $0x110] sm:$0xff] }
  0x9d   : > { %5855 = vmatmul.mubr.msk.f32.vlgmr.msra.gmra.mrb[0].mxu0 %vm426_vm0, %v4961_v61 }
  0x9e   : > { %5869 = vmatmul.mubr.msk.f32.vlgmr.msra.gmra.mrb[0].mxu1 %vm426_vm0, %v4961_v61  ;;  %5857 = vmatprep.mubr.msk.f32.mxu0 %vm426_vm0, %v4962_v62  ;;  %v6502_v61 = vpack.c.bf16 %v3059_v60, %v3058_v58  ;;  %v3065_v58 = vld [vmem:[%s8292_s5 + $0x10] sm:$0xff]  ;;  %v3066_v60 = vld [vmem:[%s8292_s5 + $0x18] sm:$0xff] }
  0x9f   : > { %5871 = vmatprep.mubr.msk.f32.mxu1 %vm426_vm0, %v4962_v62  ;;  %v4999_v62 = vld [vmem:[%s8291_s4 + $0x98] sm:$0xff]  ;;  %v6534_v0 = vpack.c.bf16 %v3066_v60, %v3065_v58  ;;  %v5091_v60 = vld [vmem:[%s8291_s4 + $0x1b0] sm:$0xf] }
  0xa1   : > { %5858 = vmatmul.mubr.msk.f32.gmra.mrb[2].mxu0 %vm426_vm0, %v4963_v63 }
  0xa2   : > { %5872 = vmatmul.mubr.msk.f32.gmra.mrb[2].mxu1 %vm426_vm0, %v4963_v63  ;;  %5882 = vmatprep.mubr.msk.f32.mxu0 %vm2877_vm2, %v7618_v9  ;;  %v5000_v63 = vld [vmem:[%s8291_s4 + $0xa0] sm:$0xff]  ;;  %vm4164_vm0 = vcmask 364544  }
  0xa3   : > { %5893 = vmatprep.mubr.msk.f32.mxu1 %vm2877_vm2, %v7621_v10  ;;  %v6486_v1 = vpack.c.bf16 %v5000_v63, %v4999_v62  ;;  %v5056_v62 = vld [vmem:[%s8291_s4 + $0x120] sm:$0xff] }
 0x170   : > { %v5856_v12 = vpop.f32.mrb[0].mxu0 }
 0x171   : > { %v5870_v13 = vpop.f32.mrb[0].mxu1  ;;  %v2720_v15 = vpop.f32.mrb[1].mxu0 }
 0x172   : > { %v2838_v16 = vmax.f32 %v5856_v12, %v5870_v13  ;;  %v2814_v17 = vpop.f32.mrb[1].mxu1  ;;  %v6510_v12 = vpack.c.bf16 %v5009_v7, %v5008_v6  ;;  %v5026_v13 = vld [vmem:[%s8291_s4 + $0xb8] sm:$0xff] }
 0x173   : > { %v2837_v18 = vmax.f32 %v2720_v15, %v2814_v17 }
 0x174   : > { %v2849_v19 = vadd.f32 %v4980_v14, %v2838_v16  ;;  %v5859_v20 = vpop.f32.mrb[2].mxu0 }
 0x175   : > { %v2848_v21 = vadd.f32 %v4980_v14, %v2837_v18  ;;  %v5873_v22 = vpop.f32.mrb[2].mxu1  ;;  %v2730_v23 = vpop.f32.mrb[3].mxu0 }
 0x176   : > { %v2853_v24 = vmax.f32 %v2849_v19, 0.0  ;;  %v2840_v25 = vmax.f32 %v5859_v20, %v5873_v22  ;;  %v2824_v26 = vpop.f32.mrb[3].mxu1  ;;  %v5011_v22 = vld [vmem:[%s8292_s5 + $0x70] sm:$0xff] }
 0x177   : > { %v2852_v27 = vmax.f32 %v2848_v21, 0.0  ;;  %v2839_v28 = vmax.f32 %v2730_v23, %v2824_v26  ;;  %v5010_v21 = vld [vmem:[%s8292_s5 + $0x68] sm:$0xff]  ;;  %v5027_v23 = vld [vmem:[%s8291_s4 + $0xc0] sm:$0xff] }
 0x178   : > { %v2851_v29 = vadd.f32 %v4980_v14, %v2840_v25  ;;  %v5012_v25 = vld [vmem:[%s8292_s5 + $0x78] sm:$0xff]  ;;  %v5013_v26 = vld [vmem:[%s8292_s5 + $0x80] sm:$0xff]  ;;  %v6514_v32 = vpack.c.bf16 %v5011_v22, %v5010_v21  ;;  %v5062_v21 = vld [vmem:[%s8291_s4 + $0x150] sm:$0xff] }
 0x179   : > { %v6450_v30 = vpack.c.bf16 %v2853_v24, %v2852_v27  ;;  %v2850_v31 = vadd.f32 %v4980_v14, %v2839_v28  ;;  %v6550_v14 = vpack.c.bf16 %v5026_v13, %v5025_v11  ;;  %v5028_v24 = vld [vmem:[%s8291_s4 + $0xc8] sm:$0xff]  ;;  %v6518_v36 = vpack.c.bf16 %v5013_v26, %v5012_v25  ;;  %v3070_v13 = vld [vmem:[%s8292_s5 + $0x38] sm:$0xff]  ;;  %v5039_v26 = vld [vmem:[%s8292_s5 + $0xb0] sm:$0xff] }
 0x17a   : > { %v2855_v33 = vmax.f32 %v2851_v29, 0.0  ;;  %v5029_v29 = vld [vmem:[%s8291_s4 + $0xd0] sm:$0xff]  ;;  %v5063_v25 = vld [vmem:[%s8291_s4 + $0x158] sm:$0xf] }
 0x17b   : > { %v2854_v37 = vmax.f32 %v2850_v31, 0.0  ;;  %6451 = vmatprep.subr.bf16.mxu0 %v6450_v30  ;;  %6461 = vmatprep.subr.bf16.mxu1 %v6450_v30 }
 0x17c   : > { %6453 = vmatpush3.bf16.msra.mxu0 %v6450_v30  ;;  %6463 = vmatpush3.bf16.msra.mxu1 %v6450_v30 }
 0x17d   : > { %v6454_v39 = vpack.c.bf16 %v2855_v33, %v2854_v37  ;;  %v6554_v33 = vpack.c.bf16 %v5028_v24, %v5027_v23  ;;  %v6558_v37 = vpack.c.bf16 %v5030_v34, %v5029_v29  ;;  %v3073_v24 = vld [vmem:[%s8292_s5 + $0x50] sm:$0xf]  ;;  %v5082_v29 = vld [vmem:[%s8291_s4 + $0x168] sm:$0xff] }
 0x17f   : > { %6456 = vmatprep.subr.msk.bf16.mxu0 %vm7647_vm8, %v6454_v39  ;;  %6466 = vmatprep.subr.msk.bf16.mxu1 %vm7647_vm8, %v6454_v39 }
 0x180   : > { %6459 = vmatpush3.bf16.msk.msra.mxu0 %vm7647_vm8, %v6454_v39  ;;  %6469 = vmatpush3.bf16.msk.msra.mxu1 %vm7647_vm8, %v6454_v39  ;;  %v5014_v39 = vld [vmem:[%s8292_s5 + $0x88] sm:$0xff] }
 0x181   : > { %6471 = vmatprep.subr.bf16.mxu1 %v6470_v40  ;;  %6491 = vmatprep.subr.bf16.mxu0 %v6490_v41 }
 0x183   : > { %5883 = vmatmul.mubr.msk.f32.vlgmr.msra.gmra.mrb[4].mxu0 %vm2877_vm2, %v4982_v46  ;;  %5894 = vmatmul.mubr.msk.f32.vlgmr.msra.gmra.mrb[4].mxu1 %vm2877_vm2, %v4984_v47  ;;  %v5017_v46 = vld [vmem:[%s8292_s5 + $0xa0] sm:$0xff]  ;;  %v5033_v47 = vld [vmem:[%s8291_s4 + $0xf0] sm:$0xff]  ;;  %vm4604_vm2 = vcmask 654336  }
 0x184   : > { %6473 = vmatpush3.bf16.msra.mxu1 %v6470_v40  ;;  %6493 = vmatpush3.bf16.msra.mxu0 %v6490_v41  ;;  %v5015_v40 = vld [vmem:[%s8292_s5 + $0x90] sm:$0xff]  ;;  %v5031_v41 = vld [vmem:[%s8291_s4 + $0xe0] sm:$0xff] }
 0x185   : > { %6475 = vmatprep.subr.bf16.mxu1 %v6474_v48  ;;  %6495 = vmatprep.subr.bf16.mxu0 %v6494_v49  ;;  %v6522_v43 = vpack.c.bf16 %v5015_v40, %v5014_v39  ;;  %v6562_v44 = vpack.c.bf16 %v5032_v42, %v5031_v41  ;;  %v5043_v41 = vld [vmem:[%s8292_s5 + $0xd0] sm:$0xff]  ;;  %v5044_v42 = vld [vmem:[%s8292_s5 + $0xd8] sm:$0xff] }
 0x188   : > { %6477 = vmatpush3.bf16.msra.mxu1 %v6474_v48  ;;  %6497 = vmatpush3.bf16.msra.mxu0 %v6494_v49  ;;  %v5034_v48 = vld [vmem:[%s8291_s4 + $0xf8] sm:$0xff]  ;;  %v6526_v49 = vpack.c.bf16 %v5017_v46, %v5016_v45  ;;  %v6578_v46 = vpack.c.bf16 %v5044_v42, %v5043_v41 }
 0x189   : > { %6479 = vmatprep.subr.bf16.mxu1 %v6478_v54  ;;  %6499 = vmatprep.subr.bf16.mxu0 %v6498_v55  ;;  %v6566_v50 = vpack.c.bf16 %v5034_v48, %v5033_v47  ;;  %v5045_v48 = vld [vmem:[%s8292_s5 + $0xe0] sm:$0xff] }
 0x18c   : > { %6481 = vmatpush3.bf16.msra.mxu1 %v6478_v54  ;;  %6501 = vmatpush3.bf16.msra.mxu0 %v6498_v55  ;;  %v3064_v54 = vld [vmem:[%s8292_s5 + $0x8] sm:$0xff] }
 0x18d   : > { %6483 = vmatprep.subr.bf16.mxu1 %v6482_v59  ;;  %6503 = vmatprep.subr.bf16.mxu0 %v6502_v61  ;;  %v5053_v55 = vld [vmem:[%s8291_s4 + $0x108] sm:$0xff]  ;;  %v6530_v57 = vpack.c.bf16 %v3064_v54, %v3063_v53  ;;  %v5047_v53 = vld [vmem:[%s8292_s5 + $0xf0] sm:$0xff]  ;;  %v5048_v54 = vld [vmem:[%s8292_s5 + $0xf8] sm:$0xff] }
 0x190   : > { %6485 = vmatpush3.bf16.msra.mxu1 %v6482_v59  ;;  %6505 = vmatpush3.bf16.msra.mxu0 %v6502_v61  ;;  %v6590_v59 = vpack.c.bf16 %v5054_v56, %v5053_v55  ;;  %v5055_v61 = vld [vmem:[%s8291_s4 + $0x118] sm:$0xff]  ;;  %v5089_v55 = vld [vmem:[%s8291_s4 + $0x1a0] sm:$0xff]  ;;  %v5090_v56 = vld [vmem:[%s8291_s4 + $0x1a8] sm:$0xff] }
 0x191   : > { %6487 = vmatprep.subr.bf16.mxu1 %v6486_v1  ;;  %6507 = vmatprep.subr.bf16.mxu0 %v6506_v3  ;;  %v6646_v58 = vpack.c.bf16 %v5090_v56, %v5089_v55  ;;  %v4171_v55 = vld [vmem:[%s8294_s7 + $0x18] sm:$0xff]  ;;  %v4173_v56 = vld [vmem:[%s8294_s7 + $0x28] sm:$0x1f] }
 0x194   : > { %6489 = vmatpush3.bf16.msra.mxu1 %v6486_v1  ;;  %6509 = vmatpush3.bf16.msra.mxu0 %v6506_v3  ;;  %v6594_v1 = vpack.c.bf16 %v5056_v62, %v5055_v61  ;;  %v3068_v3 = vld [vmem:[%s8292_s5 + $0x28] sm:$0xff]  ;;  %v5068_v62 = vld [vmem:[%s8292_s5 + $0x110] sm:$0xff] }
 0x195   : > { %5916 = vmatprep.subr.msk.mxu1 %vm3094_vm9, %v5001_v4  ;;  %5941 = vmatprep.subr.msk.mxu0 %vm3094_vm9, %v3062_v5  ;;  %v6538_v7 = vpack.c.bf16 %v3068_v3, %v3067_v2  ;;  %v5067_v61 = vld [vmem:[%s8292_s5 + $0x108] sm:$0xff] }
 0x196   : > { %v6610_v2 = vpack.c.bf16 %v5068_v62, %v5067_v61  ;;  %v4596_v62 = vld [vmem:[%s8296_s9 + $0x18] sm:$0xff] }
 0x198   : > { %5917 = vmatpush3.msk.msra.mxu1 %vm3094_vm9, %v5001_v4  ;;  %5942 = vmatpush3.msk.msra.mxu0 %vm3094_vm9, %v3062_v5  ;;  %v5057_v4 = vld [vmem:[%s8291_s4 + $0x128] sm:$0xff]  ;;  %v5058_v5 = vld [vmem:[%s8291_s4 + $0x130] sm:$0xff] }
 0x199   : > { %6511 = vmatprep.subr.bf16.mxu1 %v6510_v12  ;;  %6551 = vmatprep.subr.bf16.mxu0 %v6550_v14  ;;  %v6598_v11 = vpack.c.bf16 %v5058_v5, %v5057_v4  ;;  %v5071_v5 = vld [vmem:[%s8292_s5 + $0x128] sm:$0xff] }
 0x256   : > { %v5884_v15 = vpop.f32.mrb[4].mxu0  ;;  %v5895_v16 = vpop.f32.mrb[4].mxu1 }
 0x257   : > { %v3045_v17 = vmax.f32 %v5884_v15, %v5895_v16  ;;  %v2954_v18 = vpop.f32.mrb[5].mxu0  ;;  %v3035_v19 = vpop.f32.mrb[5].mxu1  ;;  %v5060_v15 = vld [vmem:[%s8291_s4 + $0x140] sm:$0xff] }
 0x258   : > { %v3044_v20 = vmax.f32 %v2954_v18, %v3035_v19  ;;  %v3071_v18 = vld [vmem:[%s8292_s5 + $0x40] sm:$0xff]  ;;  %v3072_v19 = vld [vmem:[%s8292_s5 + $0x48] sm:$0xff] }
 0x259   : > { %3049 = vst.msk [vmem:[#allocation2 + $0x8] sm:$0x3f] %vm3048_vm10, %v3045_v17  ;;  %v6546_v22 = vpack.c.bf16 %v3072_v19, %v3071_v18  ;;  %v5096_v18 = vld [vmem:[%s8292_s5 + $0x168] sm:$0xff]  ;;  %v5097_v19 = vld [vmem:[%s8292_s5 + $0x170] sm:$0xff] }
 0x25a   : > { %3047 = vst.msk [vmem:[#allocation2] sm:$0xff] %vm3046_vm11, %v3044_v20  ;;  %v5061_v20 = vld [vmem:[%s8291_s4 + $0x148] sm:$0xff] }
 0x25b   : > { %v6606_v23 = vpack.c.bf16 %v5062_v21, %v5061_v20  ;;  %v5098_v20 = vld [vmem:[%s8292_s5 + $0x178] sm:$0xff] }
 0x260   : > { %v3075_v30 = vld [vmem:[#allocation2 + $0x9] sm:$0x3]  ;;  %v7917_v39 = vld [vmem:[#allocation2 + $0xb] sm:$0x3] }
 0x261   : > { %v3074_v27 = vld [vmem:[#allocation2 + $0x1] sm:$0xff]  ;;  %v7835_v63 = vld [vmem:[#allocation2 + $0xa] sm:$0x3]  ;;  %v3810_v4 = vld [vmem:[#allocation2 + $0xc] sm:$0x3] }
 0x262   : > { %v7755_v28 = vld [vmem:[#allocation2] sm:$0xff]  ;;  %5918 = vmatprep.mubr.msk.f32.mxu1 %vm3046_vm11, %v3074_v27  ;;  %v7763_v31 = vld [vmem:[#allocation2 + $0x8] sm:$0x3] }
 0x263   : > { %5943 = vmatprep.mubr.msk.f32.mxu0 %vm3046_vm11, %v7755_v28  ;;  %5919 = vmatmul.mubr.msk.f32.vlgmr.msra.gmra.mrb[6].mxu1 %vm3046_vm11, %v3075_v30  ;;  %v7771_v35 = vld [vmem:[#allocation2 + $0x2] sm:$0xff] }
 0x264   : > { %5944 = vmatmul.mubr.msk.f32.vlgmr.msra.gmra.mrb[6].mxu0 %vm3046_vm11, %v7763_v31  ;;  %6513 = vmatpush3.bf16.msra.mxu1 %v6510_v12  ;;  %v7853_v6 = vld [vmem:[#allocation2 + $0x3] sm:$0xff]  ;;  %v3069_v12 = vld [vmem:[%s8292_s5 + $0x30] sm:$0xff] }
 0x265   : > { %6553 = vmatpush3.bf16.msra.mxu0 %v6550_v14  ;;  %5968 = vmatprep.mubr.msk.f32.mxu1 %vm3046_vm11, %v3074_v27  ;;  %v5059_v14 = vld [vmem:[%s8291_s4 + $0x138] sm:$0xff]  ;;  %v6542_v16 = vpack.c.bf16 %v3070_v13, %v3069_v12  ;;  %v7935_v45 = vld [vmem:[#allocation2 + $0x4] sm:$0xff] }
 0x266   : > { %6018 = vmatprep.mubr.msk.f32.mxu0 %vm3046_vm11, %v7771_v35  ;;  %6515 = vmatprep.subr.bf16.mxu1 %v6514_v32  ;;  %v6602_v17 = vpack.c.bf16 %v5060_v15, %v5059_v14  ;;  %v5040_v27 = vld [vmem:[%s8292_s5 + $0xb8] sm:$0xff]  ;;  %v5074_v12 = vld [vmem:[%s8292_s5 + $0x140] sm:$0xff]  ;;  %v5075_v14 = vld [vmem:[%s8292_s5 + $0x148] sm:$0xff] }
 0x267   : > { %6555 = vmatprep.subr.bf16.mxu0 %v6554_v33 }
 0x268   : > { %6517 = vmatpush3.bf16.msra.mxu1 %v6514_v32  ;;  %v5041_v32 = vld [vmem:[%s8292_s5 + $0xc0] sm:$0xff] }
 0x269   : > { %6557 = vmatpush3.bf16.msra.mxu0 %v6554_v33  ;;  %6519 = vmatprep.subr.bf16.mxu1 %v6518_v36  ;;  %v5042_v33 = vld [vmem:[%s8292_s5 + $0xc8] sm:$0xff] }
 0x26a   : > { %6559 = vmatprep.subr.bf16.mxu0 %v6558_v37  ;;  %v6574_v40 = vpack.c.bf16 %v5042_v33, %v5041_v32  ;;  %v5105_v33 = vld [vmem:[%s8292_s5 + $0x1b0] sm:$0xf] }
 0x26c   : > { %6521 = vmatpush3.bf16.msra.mxu1 %v6518_v36  ;;  %v5083_v36 = vld [vmem:[%s8291_s4 + $0x170] sm:$0xff] }
 0x26d   : > { %6561 = vmatpush3.bf16.msra.mxu0 %v6558_v37  ;;  %6523 = vmatprep.subr.bf16.mxu1 %v6522_v43  ;;  %v5084_v37 = vld [vmem:[%s8291_s4 + $0x178] sm:$0xff] }
 0x26e   : > { %6563 = vmatprep.subr.bf16.mxu0 %v6562_v44 }
 0x270   : > { %6525 = vmatpush3.bf16.msra.mxu1 %v6522_v43  ;;  %v6634_v43 = vpack.c.bf16 %v5084_v37, %v5083_v36 }
 0x271   : > { %6565 = vmatpush3.bf16.msra.mxu0 %v6562_v44  ;;  %6527 = vmatprep.subr.bf16.mxu1 %v6526_v49  ;;  %v5086_v44 = vld [vmem:[%s8291_s4 + $0x188] sm:$0xff] }
 0x272   : > { %6567 = vmatprep.subr.bf16.mxu0 %v6566_v50 }
 0x274   : > { %6529 = vmatpush3.bf16.msra.mxu1 %v6526_v49  ;;  %v5046_v49 = vld [vmem:[%s8292_s5 + $0xe8] sm:$0xff] }
 0x275   : > { %6569 = vmatpush3.bf16.msra.mxu0 %v6566_v50  ;;  %5966 = vmatprep.subr.msk.mxu1 %vm3094_vm9, %v5018_v51  ;;  %v5088_v50 = vld [vmem:[%s8291_s4 + $0x198] sm:$0xff] }
 0x276   : > { %6016 = vmatprep.subr.msk.mxu0 %vm3094_vm9, %v5035_v52 }
 0x278   : > { %5967 = vmatpush3.msk.msra.mxu1 %vm3094_vm9, %v5018_v51  ;;  %v6582_v51 = vpack.c.bf16 %v5046_v49, %v5045_v48 }
 0x279   : > { %6017 = vmatpush3.msk.msra.mxu0 %vm3094_vm9, %v5035_v52  ;;  %5969 = vmatmul.mubr.msk.f32.vlgmr.msra.gmra.mrb[8].mxu1 %vm3046_vm11, %v3075_v30  ;;  %v6570_v30 = vpack.c.bf16 %v5040_v27, %v5039_v26  ;;  %v5101_v26 = vld [vmem:[%s8292_s5 + $0x190] sm:$0xff]  ;;  %v5102_v27 = vld [vmem:[%s8292_s5 + $0x198] sm:$0xff] }
 0x27a   : > { %6531 = vmatprep.subr.bf16.mxu1 %v6530_v57  ;;  %6019 = vmatmul.mubr.msk.f32.vlgmr.msra.gmra.mrb[6].mxu0 %vm3046_vm11, %v7835_v63 }
 0x27b   : > { %6591 = vmatprep.subr.bf16.mxu0 %v6590_v59  ;;  %6533 = vmatpush3.bf16.msra.mxu1 %v6530_v57  ;;  %v6586_v57 = vpack.c.bf16 %v5048_v54, %v5047_v53  ;;  %v4170_v54 = vld [vmem:[%s8294_s7 + $0x10] sm:$0xff] }
 0x27c   : > { %5993 = vmatprep.mubr.msk.f32.mxu1 %vm3046_vm11, %v7755_v28  ;;  %6593 = vmatpush3.bf16.msra.mxu0 %v6590_v59  ;;  %v5081_v28 = vld [vmem:[%s8291_s4 + $0x160] sm:$0xff] }
 0x27d   : > { %6068 = vmatprep.mubr.msk.f32.mxu0 %vm3046_vm11, %v7853_v6  ;;  %6535 = vmatprep.subr.bf16.mxu1 %v6534_v0  ;;  %v6630_v34 = vpack.c.bf16 %v5082_v29, %v5081_v28  ;;  %v5049_v59 = vld [vmem:[%s8292_s5 + $0x100] sm:$0xf]  ;;  %v6662_v28 = vpack.c.bf16 %v5102_v27, %v5101_v26  ;;  %v5126_v27 = vld [vmem:[%s8294_s7 + $0x70] sm:$0xff] }
 0x27e   : > { %6595 = vmatprep.subr.bf16.mxu0 %v6594_v1  ;;  %v5103_v29 = vld [vmem:[%s8292_s5 + $0x1a0] sm:$0xff] }
 0x27f   : > { %6537 = vmatpush3.bf16.msra.mxu1 %v6534_v0  ;;  %v5069_v0 = vld [vmem:[%s8292_s5 + $0x118] sm:$0xff] }
 0x280   : > { %6597 = vmatpush3.bf16.msra.mxu0 %v6594_v1  ;;  %6539 = vmatprep.subr.bf16.mxu1 %v6538_v7  ;;  %v5070_v1 = vld [vmem:[%s8292_s5 + $0x120] sm:$0xff] }
 0x281   : > { %6599 = vmatprep.subr.bf16.mxu0 %v6598_v11  ;;  %v6614_v3 = vpack.c.bf16 %v5070_v1, %v5069_v0  ;;  %v4597_v1 = vld [vmem:[%s8296_s9 + $0x20] sm:$0xff] }
 0x283   : > { %6541 = vmatpush3.bf16.msra.mxu1 %v6538_v7  ;;  %v5072_v7 = vld [vmem:[%s8292_s5 + $0x130] sm:$0xff] }
 0x284   : > { %6601 = vmatpush3.bf16.msra.mxu0 %v6598_v11  ;;  %6543 = vmatprep.subr.bf16.mxu1 %v6542_v16  ;;  %v6618_v11 = vpack.c.bf16 %v5072_v7, %v5071_v5  ;;  %v4600_v5 = vld [vmem:[%s8296_s9 + $0x38] sm:$0xff] }
 0x285   : > { %6603 = vmatprep.subr.bf16.mxu0 %v6602_v17 }
 0x287   : > { %6545 = vmatpush3.bf16.msra.mxu1 %v6542_v16  ;;  %v5077_v16 = vld [vmem:[%s8292_s5 + $0x158] sm:$0xf] }
 0x288   : > { %6605 = vmatpush3.bf16.msra.mxu0 %v6602_v17  ;;  %6547 = vmatprep.subr.bf16.mxu1 %v6546_v22  ;;  %v5095_v17 = vld [vmem:[%s8292_s5 + $0x160] sm:$0xff] }
 0x289   : > { %6607 = vmatprep.subr.bf16.mxu0 %v6606_v23  ;;  %v6650_v21 = vpack.c.bf16 %v5096_v18, %v5095_v17  ;;  %v5118_v17 = vld [vmem:[%s8294_s7 + $0x40] sm:$0xff]  ;;  %v5119_v18 = vld [vmem:[%s8294_s7 + $0x48] sm:$0xff] }
 0x28b   : > { %6549 = vmatpush3.bf16.msra.mxu1 %v6546_v22  ;;  %v6654_v22 = vpack.c.bf16 %v5098_v20, %v5097_v19  ;;  %v6692_v20 = vpack.c.bf16 %v5119_v18, %v5118_v17 }
 0x28c   : > { %6609 = vmatpush3.bf16.msra.mxu0 %v6606_v23  ;;  %5991 = vmatprep.subr.msk.mxu1 %vm3094_vm9, %v3073_v24  ;;  %v5099_v23 = vld [vmem:[%s8292_s5 + $0x180] sm:$0xff] }
 0x28d   : > { %6066 = vmatprep.subr.msk.mxu0 %vm3094_vm9, %v5063_v25 }
 0x28f   : > { %5992 = vmatpush3.msk.msra.mxu1 %vm3094_vm9, %v3073_v24  ;;  %v5100_v24 = vld [vmem:[%s8292_s5 + $0x188] sm:$0xff] }
 0x290   : > { %6067 = vmatpush3.msk.msra.mxu0 %vm3094_vm9, %v5063_v25  ;;  %5994 = vmatmul.mubr.msk.f32.vlgmr.msra.gmra.mrb[8].mxu1 %vm3046_vm11, %v7763_v31  ;;  %v5085_v31 = vld [vmem:[%s8291_s4 + $0x180] sm:$0xff]  ;;  %v6658_v25 = vpack.c.bf16 %v5100_v24, %v5099_v23 }
 0x291   : > { %6571 = vmatprep.subr.bf16.mxu1 %v6570_v30  ;;  %6069 = vmatmul.mubr.msk.f32.vlgmr.msra.gmra.mrb[6].mxu0 %vm3046_vm11, %v7917_v39  ;;  %v6638_v47 = vpack.c.bf16 %v5086_v44, %v5085_v31  ;;  %v5109_v31 = vld [vmem:[%s8293_s6] ss:$0 sm:$0xff] }
 0x292   : > { %6631 = vmatprep.subr.bf16.mxu0 %v6630_v34  ;;  %6573 = vmatpush3.bf16.msra.mxu1 %v6570_v30  ;;  %v5104_v30 = vld [vmem:[%s8292_s5 + $0x1a8] sm:$0xff]  ;;  %v5124_v24 = vld [vmem:[%s8294_s7 + $0x60] sm:$0xff] }
 0x293   : > { %6043 = vmatprep.mubr.msk.f32.mxu1 %vm3046_vm11, %v7771_v35  ;;  %6633 = vmatpush3.bf16.msra.mxu0 %v6630_v34  ;;  %v5087_v35 = vld [vmem:[%s8291_s4 + $0x190] sm:$0xff]  ;;  %v6666_v32 = vpack.c.bf16 %v5104_v30, %v5103_v29  ;;  %v7014_v34 = vmov 0.0|0.0  }
 0x294   : > { %6118 = vmatprep.mubr.msk.f32.mxu0 %vm3046_vm11, %v7935_v45  ;;  %6575 = vmatprep.subr.bf16.mxu1 %v6574_v40  ;;  %v6642_v52 = vpack.c.bf16 %v5088_v50, %v5087_v35  ;;  %v4168_v50 = vld [vmem:[%s8294_s7] sm:$0xff] }
 0x295   : > { %6635 = vmatprep.subr.bf16.mxu0 %v6634_v43 }
 0x296   : > { %6577 = vmatpush3.bf16.msra.mxu1 %v6574_v40 }
 0x297   : > { %6637 = vmatpush3.bf16.msra.mxu0 %v6634_v43  ;;  %6579 = vmatprep.subr.bf16.mxu1 %v6578_v46 }
 0x298   : > { %6639 = vmatprep.subr.bf16.mxu0 %v6638_v47 }
 0x29a   : > { %6581 = vmatpush3.bf16.msra.mxu1 %v6578_v46 }
 0x29b   : > { %6641 = vmatpush3.bf16.msra.mxu0 %v6638_v47  ;;  %6583 = vmatprep.subr.bf16.mxu1 %v6582_v51 }
 0x29c   : > { %6643 = vmatprep.subr.bf16.mxu0 %v6642_v52 }
 0x29e   : > { %6585 = vmatpush3.bf16.msra.mxu1 %v6582_v51  ;;  %v4169_v51 = vld [vmem:[%s8294_s7 + $0x8] sm:$0xff] }
 0x29f   : > { %6645 = vmatpush3.bf16.msra.mxu0 %v6642_v52  ;;  %6587 = vmatprep.subr.bf16.mxu1 %v6586_v57  ;;  %v6679_v53 = vpack.c.bf16 %v4169_v51, %v4168_v50  ;;  %v5143_v50 = vld [vmem:[%s8294_s7 + $0xd8] sm:$0xff] }
 0x2a0   : > { %6647 = vmatprep.subr.bf16.mxu0 %v6646_v58 }
 0x2a2   : > { %6589 = vmatpush3.bf16.msra.mxu1 %v6586_v57 }
 0x2a3   : > { %6649 = vmatpush3.bf16.msra.mxu0 %v6646_v58  ;;  %6041 = vmatprep.subr.msk.mxu1 %vm3094_vm9, %v5049_v59  ;;  %v4593_v58 = vld [vmem:[%s8296_s9] sm:$0xff] }
 0x2a4   : > { %6116 = vmatprep.subr.msk.mxu0 %vm3094_vm9, %v5091_v60 }
 0x2a6   : > { %6042 = vmatpush3.msk.msra.mxu1 %vm3094_vm9, %v5049_v59  ;;  %v4594_v59 = vld [vmem:[%s8296_s9 + $0x8] sm:$0xff] }
 0x2a7   : > { %6117 = vmatpush3.msk.msra.mxu0 %vm3094_vm9, %v5091_v60  ;;  %6044 = vmatmul.mubr.msk.f32.vlgmr.msra.gmra.mrb[8].mxu1 %vm3046_vm11, %v7835_v63  ;;  %v5073_v63 = vld [vmem:[%s8292_s5 + $0x138] sm:$0xff]  ;;  %v4595_v60 = vld [vmem:[%s8296_s9 + $0x10] sm:$0xff]  ;;  %v6729_v61 = vpack.c.bf16 %v4594_v59, %v4593_v58 }
 0x2a8   : > { %6611 = vmatprep.subr.bf16.mxu1 %v6610_v2  ;;  %6119 = vmatmul.mubr.msk.f32.vlgmr.msra.gmra.mrb[6].mxu0 %vm3046_vm11, %v3810_v4  ;;  %v6622_v13 = vpack.c.bf16 %v5074_v12, %v5073_v63  ;;  %v6732_v0 = vpack.c.bf16 %v4596_v62, %v4595_v60  ;;  %v4603_v60 = vld [vmem:[%s8297_s10] sm:$0x1] }
 0x2a9   : > { %6613 = vmatpush3.bf16.msra.mxu1 %v6610_v2  ;;  %6093 = vmatprep.mubr.msk.f32.mxu1 %vm3046_vm11, %v7853_v6  ;;  %v5076_v6 = vld [vmem:[%s8292_s5 + $0x150] sm:$0xff]  ;;  %v4598_v2 = vld [vmem:[%s8296_s9 + $0x28] sm:$0xff] }
 0x2aa   : > { %6615 = vmatprep.subr.bf16.mxu1 %v6614_v3  ;;  %v6626_v15 = vpack.c.bf16 %v5076_v6, %v5075_v14  ;;  %6670 = vmatprep.subr.bf16.mxu0 %v7014_v34  ;;  %v5116_v6 = vld [vmem:[%s8294_s7 + $0x30] sm:$0xff] }
 0x2ab   : > { %6150 = vmatprep.mubr.msk.f32.mxu0 %vm7015_vm12, %v7012_v8 }
 0x2ad   : > { %6617 = vmatpush3.bf16.msra.mxu1 %v6614_v3  ;;  %v6735_v3 = vpack.c.bf16 %v4598_v2, %v4597_v1 }
 0x2ae   : > { %6619 = vmatprep.subr.bf16.mxu1 %v6618_v11 }
 0x2b1   : > { %6621 = vmatpush3.bf16.msra.mxu1 %v6618_v11 }
 0x2b2   : > { %6623 = vmatprep.subr.bf16.mxu1 %v6622_v13 }
 0x2b5   : > { %6625 = vmatpush3.bf16.msra.mxu1 %v6622_v13 }
 0x2b6   : > { %6627 = vmatprep.subr.bf16.mxu1 %v6626_v15 }
 0x2b9   : > { %6629 = vmatpush3.bf16.msra.mxu1 %v6626_v15  ;;  %v5117_v15 = vld [vmem:[%s8294_s7 + $0x38] sm:$0xff] }
 0x2ba   : > { %6091 = vmatprep.subr.msk.mxu1 %vm3094_vm9, %v5077_v16 }
 0x2bd   : > { %6092 = vmatpush3.msk.msra.mxu1 %vm3094_vm9, %v5077_v16  ;;  %v6689_v16 = vpack.c.bf16 %v5117_v15, %v5116_v6 }
 0x2be   : > { %6094 = vmatmul.mubr.msk.f32.vlgmr.msra.gmra.mrb[8].mxu1 %vm3046_vm11, %v7917_v39  ;;  %6651 = vmatprep.subr.bf16.mxu1 %v6650_v21 }
 0x2bf   : > { %6653 = vmatpush3.bf16.msra.mxu1 %v6650_v21  ;;  %6143 = vmatprep.mubr.msk.f32.mxu1 %vm3046_vm11, %v7935_v45  ;;  %v5120_v21 = vld [vmem:[%s8294_s7 + $0x50] sm:$0xff] }
 0x2c0   : > { %6655 = vmatprep.subr.bf16.mxu1 %v6654_v22 }
 0x2c3   : > { %6657 = vmatpush3.bf16.msra.mxu1 %v6654_v22  ;;  %v5121_v22 = vld [vmem:[%s8294_s7 + $0x58] sm:$0x1f] }
 0x2c4   : > { %6659 = vmatprep.subr.bf16.mxu1 %v6658_v25  ;;  %v6695_v23 = vpack.c.bf16 %v5121_v22, %v5120_v21 }
 0x2c7   : > { %6661 = vmatpush3.bf16.msra.mxu1 %v6658_v25  ;;  %v5125_v25 = vld [vmem:[%s8294_s7 + $0x68] sm:$0xff] }
 0x2c8   : > { %6663 = vmatprep.subr.bf16.mxu1 %v6662_v28  ;;  %v6699_v26 = vpack.c.bf16 %v5125_v25, %v5124_v24 }
 0x2cb   : > { %6665 = vmatpush3.bf16.msra.mxu1 %v6662_v28  ;;  %v5127_v28 = vld [vmem:[%s8294_s7 + $0x78] sm:$0xff] }
 0x2cc   : > { %6667 = vmatprep.subr.bf16.mxu1 %v6666_v32  ;;  %v6702_v30 = vpack.c.bf16 %v5127_v28, %v5126_v27 }
 0x2cf   : > { %6669 = vmatpush3.bf16.msra.mxu1 %v6666_v32  ;;  %v5128_v32 = vld [vmem:[%s8294_s7 + $0x80] sm:$0xff] }
 0x2d0   : > { %6141 = vmatprep.subr.msk.mxu1 %vm3094_vm9, %v5105_v33 }
 0x2d3   : > { %6142 = vmatpush3.msk.msra.mxu1 %vm3094_vm9, %v5105_v33  ;;  %v5129_v33 = vld [vmem:[%s8294_s7 + $0x88] sm:$0x1f] }
 0x2d4   : > { %6144 = vmatmul.mubr.msk.f32.vlgmr.msra.gmra.mrb[8].mxu1 %vm3046_vm11, %v3810_v4  ;;  %6674 = vmatprep.subr.bf16.mxu1 %v7014_v34  ;;  %v4599_v4 = vld [vmem:[%s8296_s9 + $0x30] sm:$0xff] }
 0x2d5   : > { %6157 = vmatprep.mubr.msk.f32.mxu1 %vm7015_vm12, %v7012_v8  ;;  %v6738_v7 = vpack.c.bf16 %v4600_v5, %v4599_v4 }
 0x336   : > { %v5920_v36 = vpop.f32.mrb[6].mxu1 }
 0x337   : > { %v3164_v37 = vpop.f32.mrb[7].mxu1 }
 0x37b   : > { %v6120_v39 = vpop.f32.mrb[6].mxu0 }
 0x37c   : > { %v6743_v40 = vadd.f32 %v6120_v39, %v5920_v36  ;;  %v3898_v41 = vpop.f32.mrb[7].mxu0  ;;  %v6705_v36 = vpack.c.bf16 %v5129_v33, %v5128_v32  ;;  %v5133_v39 = vld [vmem:[%s8294_s7 + $0x98] sm:$0xff] }
 0x37d   : > { %v6744_v42 = vadd.f32 %v3898_v41, %v3164_v37  ;;  %v5132_v37 = vld [vmem:[%s8294_s7 + $0x90] sm:$0xff]  ;;  %v5134_v41 = vld [vmem:[%s8294_s7 + $0xa0] sm:$0xff] }
 0x3a7   : > { %v6145_v43 = vpop.f32.mrb[8].mxu1 }
 0x3a8   : > { %v4002_v44 = vmax.f32 %v6743_v40, %v6145_v43  ;;  %v3990_v45 = vpop.f32.mrb[9].mxu1  ;;  %v6709_v40 = vpack.c.bf16 %v5133_v39, %v5132_v37 }
 0x3a9   : > { %v4001_v46 = vmax.f32 %v6744_v42, %v3990_v45  ;;  %v5135_v42 = vld [vmem:[%s8294_s7 + $0xa8] sm:$0xff]  ;;  %v5137_v45 = vld [vmem:[%s8294_s7 + $0xb8] sm:$0x1f] }
 0x3aa   : > { %v4011_v47 = vadd.f32 %v5109_v31, %v4002_v44  ;;  %v5136_v44 = vld [vmem:[%s8294_s7 + $0xb0] sm:$0xff] }
 0x3ab   : > { %v4010_v48 = vadd.f32 %v5109_v31, %v4001_v46  ;;  %v6712_v31 = vpack.c.bf16 %v5135_v42, %v5134_v41  ;;  %v6715_v46 = vpack.c.bf16 %v5137_v45, %v5136_v44 }
 0x3ac   : > { %v4013_v49 = vmax.f32 %v4011_v47, 0.0  ;;  %v5140_v47 = vld [vmem:[%s8294_s7 + $0xc0] sm:$0xff] }
 0x3ad   : > { %v4012_v35 = vmax.f32 %v4010_v48, 0.0  ;;  %v5141_v48 = vld [vmem:[%s8294_s7 + $0xc8] sm:$0xff] }
 0x3af   : > { %v6671_v52 = vpack.c.bf16 %v4013_v49, %v4012_v35  ;;  %v6719_v49 = vpack.c.bf16 %v5141_v48, %v5140_v47  ;;  %v5142_v35 = vld [vmem:[%s8294_s7 + $0xd0] sm:$0xff] }
 0x3b1   : > { %6673 = vmatpush3.bf16.msk.msra.mxu0 %vm6672_vm14, %v6671_v52  ;;  %6677 = vmatpush3.bf16.msk.msra.mxu1 %vm6672_vm14, %v6671_v52  ;;  %v6722_v52 = vpack.c.bf16 %v5143_v50, %v5142_v35 }
 0x3b2   : > { %6678 = vmatprep.subr.bf16.mxu0 %v7014_v34  ;;  %6728 = vmatprep.subr.bf16.mxu1 %v7014_v34 }
 0x3b4   : > { %6151 = vmatmul.mubr.msk.f32.vlgmr.msra.gmra.mrb[8].mxu0 %vm4014_vm15, %v7618_v9  ;;  %6158 = vmatmul.mubr.msk.f32.vlgmr.msra.gmra.mrb[10].mxu1 %vm4014_vm15, %v7621_v10  ;;  %v6682_v9 = vpack.c.bf16 %v4171_v55, %v4170_v54  ;;  %v4172_v10 = vld [vmem:[%s8294_s7 + $0x20] sm:$0xff]  ;;  %v5145_v54 = vld [vmem:[%s8294_s7 + $0xe8] sm:$0x1f] }
 0x3b5   : > { %6680 = vmatpush3.bf16.msra.mxu0 %v6679_v53  ;;  %6172 = vmatprep.mubr.msk.f32.mxu0 %vm7015_vm12, %v7012_v8  ;;  %v6685_v57 = vpack.c.bf16 %v4173_v56, %v4172_v10  ;;  %v5144_v53 = vld [vmem:[%s8294_s7 + $0xe0] sm:$0xff]  ;;  %v4602_v10 = vld [vmem:[%s8296_s9 + $0x48] sm:$0xff] }
 0x3b6   : > { %6681 = vmatprep.subr.bf16.mxu0 %v7014_v34  ;;  %6255 = vmatprep.mubr.msk.f32.mxu1 %vm7015_vm12, %v7012_v8  ;;  %v6725_v55 = vpack.c.bf16 %v5145_v54, %v5144_v53 }
 0x3b7   : > { %6730 = vmatpush3.bf16.msra.mxu1 %v6729_v61 }
 0x3b8   : > { %6731 = vmatprep.subr.bf16.mxu1 %v7014_v34 }
 0x3b9   : > { %6683 = vmatpush3.bf16.msra.mxu0 %v6682_v9  ;;  %v4601_v9 = vld [vmem:[%s8296_s9 + $0x40] sm:$0xff] }
 0x3ba   : > { %6684 = vmatprep.subr.bf16.mxu0 %v7014_v34  ;;  %v6741_v56 = vpack.c.bf16 %v4602_v10, %v4601_v9 }
 0x3bb   : > { %6733 = vmatpush3.bf16.msra.mxu1 %v6732_v0 }
 0x3bc   : > { %6734 = vmatprep.subr.bf16.mxu1 %v7014_v34 }
 0x3bd   : > { %6687 = vmatpush3.bf16.msk.msra.mxu0 %vm7647_vm8, %v6685_v57 }
 0x3be   : > { %6688 = vmatprep.subr.bf16.mxu0 %v7014_v34 }
 0x3bf   : > { %6736 = vmatpush3.bf16.msra.mxu1 %v6735_v3 }
 0x3c0   : > { %6737 = vmatprep.subr.bf16.mxu1 %v7014_v34 }
 0x3c3   : > { %6739 = vmatpush3.bf16.msra.mxu1 %v6738_v7 }
 0x3c4   : > { %6740 = vmatprep.subr.bf16.mxu1 %v7014_v34 }
 0x3c7   : > { %6742 = vmatpush3.bf16.msra.mxu1 %v6741_v56 }
 0x487   : > { %v4087_v11 = vpop.f32.mrb[8].mxu0  ;;  %v4159_v63 = vpop.f32.mrb[10].mxu1 }
 0x488   : > { %v4163_v12 = vmax.f32 %v4087_v11, %v4159_v63  ;;  %v6152_v13 = vpop.f32.mrb[9].mxu0  ;;  %v6159_v14 = vpop.f32.mrb[11].mxu1 }
 0x48a   : > { %4165 = vst.msk [vmem:[#allocation3] sm:$0x1f] %vm4164_vm0, %v4163_v12 }
 0x491   : > { %v4167_v19 = vld [vmem:[#allocation3] sm:$0x1]  ;;  %v4252_v29 = vld [vmem:[#allocation3 + $0x1] sm:$0x1]  ;;  %v4337_v43 = vld [vmem:[#allocation3 + $0x2] sm:$0x1] }
 0x492   : > { %6173 = vmatmul.mubr.msk.f32.vlgmr.msra.gmra.mrb[10].mxu0 %vm4174_vm1, %v4167_v19  ;;  %v4422_v51 = vld [vmem:[#allocation3 + $0x3] sm:$0x1] }
 0x493   : > { %6690 = vmatpush3.bf16.msra.mxu0 %v6689_v16  ;;  %6187 = vmatprep.mubr.msk.f32.mxu0 %vm7015_vm12, %v7012_v8 }
 0x494   : > { %6691 = vmatprep.subr.bf16.mxu0 %v7014_v34 }
 0x497   : > { %6693 = vmatpush3.bf16.msra.mxu0 %v6692_v20 }
 0x498   : > { %6694 = vmatprep.subr.bf16.mxu0 %v7014_v34 }
 0x49b   : > { %6697 = vmatpush3.bf16.msk.msra.mxu0 %vm7647_vm8, %v6695_v23 }
 0x49c   : > { %6698 = vmatprep.subr.bf16.mxu0 %v7014_v34 }
 0x49e   : > { %6188 = vmatmul.mubr.msk.f32.vlgmr.msra.gmra.mrb[10].mxu0 %vm4174_vm1, %v4252_v29 }
 0x49f   : > { %6700 = vmatpush3.bf16.msra.mxu0 %v6699_v26  ;;  %6202 = vmatprep.mubr.msk.f32.mxu0 %vm7015_vm12, %v7012_v8 }
 0x4a0   : > { %6701 = vmatprep.subr.bf16.mxu0 %v7014_v34 }
 0x4a3   : > { %6703 = vmatpush3.bf16.msra.mxu0 %v6702_v30 }
 0x4a4   : > { %6704 = vmatprep.subr.bf16.mxu0 %v7014_v34 }
 0x4a7   : > { %6707 = vmatpush3.bf16.msk.msra.mxu0 %vm7647_vm8, %v6705_v36 }
 0x4a8   : > { %6708 = vmatprep.subr.bf16.mxu0 %v7014_v34 }
 0x4aa   : > { %6203 = vmatmul.mubr.msk.f32.vlgmr.msra.gmra.mrb[10].mxu0 %vm4174_vm1, %v4337_v43 }
 0x4ab   : > { %6710 = vmatpush3.bf16.msra.mxu0 %v6709_v40  ;;  %6217 = vmatprep.mubr.msk.f32.mxu0 %vm7015_vm12, %v7012_v8 }
 0x4ac   : > { %6711 = vmatprep.subr.bf16.mxu0 %v7014_v34 }
 0x4af   : > { %6713 = vmatpush3.bf16.msra.mxu0 %v6712_v31 }
 0x4b0   : > { %6714 = vmatprep.subr.bf16.mxu0 %v7014_v34 }
 0x4b3   : > { %6717 = vmatpush3.bf16.msk.msra.mxu0 %vm7647_vm8, %v6715_v46 }
 0x4b4   : > { %6718 = vmatprep.subr.bf16.mxu0 %v7014_v34 }
 0x4b6   : > { %6218 = vmatmul.mubr.msk.f32.vlgmr.msra.gmra.mrb[10].mxu0 %vm4174_vm1, %v4422_v51 }
 0x4b7   : > { %6720 = vmatpush3.bf16.msra.mxu0 %v6719_v49  ;;  %6232 = vmatprep.mubr.msk.f32.mxu0 %vm7015_vm12, %v7012_v8  ;;  %v4507_v8 = vld [vmem:[#allocation3 + $0x4] sm:$0x1] }
 0x4b8   : > { %6721 = vmatprep.subr.bf16.mxu0 %v7014_v34 }
 0x4bb   : > { %6723 = vmatpush3.bf16.msra.mxu0 %v6722_v52 }
 0x4bc   : > { %6724 = vmatprep.subr.bf16.mxu0 %v7014_v34 }
 0x4bf   : > { %6727 = vmatpush3.bf16.msk.msra.mxu0 %vm7647_vm8, %v6725_v55 }
 0x4c2   : > { %6233 = vmatmul.mubr.msk.f32.vlgmr.msra.gmra.mrb[10].mxu0 %vm4174_vm1, %v4507_v8 }
 0x595   : > { %v4587_v34 = vpop.f32.mrb[10].mxu0 }
 0x596   : > { %v6745_v57 = vadd.f32 %v4587_v34, %v4166_v38  ;;  %v6234_v58 = vpop.f32.mrb[11].mxu0 }
 0x598   : > { %v4592_v59 = vmax.f32 %v6745_v57, 0.0 }
 0x59a   : > { %6256 = vmatmul.mubr.msk.f32.vlgmr.msra.gmra.mrb[12].mxu1 %vm4604_vm2, %v4592_v59 }
 0x66d   : > { %v4674_v61 = vpop.f32.mrb[12].mxu1 }
 0x66e   : > { %v4675_v62 = vadd.f32 %v4674_v61, %v4603_v60  ;;  %v6257_v0 = vpop.f32.mrb[13].mxu1 }
 0x670   : > { %4679 = vst.msk [vmem:[%s403_s29] sm:$0x1] %vm4678_vm3, %v4675_v62 }
 0x671   : > { %6954 = shalt.err (!%p6951_p2)
}
 0x672   : > { %s6955_s12 = scalar_lea.hbm %s8243_s26, 16  ;;  %s6959_s19 = scalar_lea.hbm %s8298_s11, 32 }
 0x673   : > { %p6956_p4 = scmp.ne.s32.totalorder %s8243_s26, %s6955_s12  ;;  %p6960_p9 = scmp.lt.u32.totalorder %s8243_s26, %s8298_s11 }
 0x674   : > { %p6961_p1 = scmp.lt.u32.totalorder %s6959_s19, %s6955_s12  ;;  %p6963_p6 = scmp.lt.u32.totalorder %s6955_s12, %s8243_s26 }
 0x675   : > { %p6957_p5 = pnand %p6956_p4, %p8316_p11 }
 0x676   : > { %p6962_p3 = por %p6961_p1, %p6960_p9 }
 0x677   : > { %p6958_p7 = pneg %p6957_p5 }
 0x678   : > { %p6964_p12 = por %p6963_p6, %p6962_p3 }
 0x67a   : > { %p6965_p13 = pnand %p6964_p12, %p6958_p7 }
 0x67c   : > { %6968 = shalt.err (!%p6965_p13)
}
 0x67d   : > { %6861 = dma.vmem_to_hbm [thread:$0]  (%p8316_p11), %s8245_s14, 16, %s8243_s26, %s4681_s16  }
 0x67e PF: > { %s8317_s15 = sld [smem:[#allocation13_spill]]  ;;  %s4705_s30 = sand.u32 1, %s6995_s17  }
 0x67f   : > { %p8319_p10 = scmp.ge.s32.totalorder %s7007_s20, 2  ;;  %s4706_s22 = scalar_lea.sflag [#allocation6], %s4705_s30 }
 0x684   : > { %p8318_p8 = scmp.ne.s32.totalorder %s8317_s15, 0 }
 0x686   : > { %p6868_p0 = pnand %p8319_p10, %p8318_p8 }
 0x688   : > { %6990 = dma.done.wait (!%p6868_p0), %s4706_s22, 16  }
 0x689   : > { %6992 = vsyncadd (!%p6868_p0), %s4706_s22, 4294967280  ;;  %s8320_s20 = sld [smem:[#allocation11_spill]]  ;;  %s8321_s21 = sld [smem:[#allocation10_spill]] }
 0x68a   : > { %s8322_s19 = sld [smem:[#allocation12_spill]]  ;;  %s8323_s17 = smov %s6999_s18 }
 0x68f   : > { %p24_p2 = scmp.ge.s32.totalorder %s8320_s20, 4   ;;  %s8324_s18 = smov %s8321_s21 }
 0x691   :  { %26 = sbr.rel (!%p24_p2) target bundleno = 5 (0x5), region = 145 }
 0x698   :  { %4710 = vsyncpa [#allocation5], 1 }
 0x699   :  { %4712 = vsyncpa [#allocation5 + $0x1], 1 }
 0x69a   :  { %4713 = vsyncpa [#allocation6], 1 }
 0x69b   :  { %4715 = vsyncpa [#allocation6 + $0x1], 1 }

</bundles_post_ra>
